<compile_context>
chip_gen: v7x
topology: tpu7x:2x2x1
jax: 0.10.0
libtpu: 0.0.40
codegen_flags: <defaults>
</compile_context>

<pallas_src>
import jax
import jax.numpy as jnp
from jax.experimental import pallas as pl
from jax.experimental.pallas import tpu as pltpu


def _linear_self_attn_kernel(x_ref, wkvq_ref, bk_ref, bv_ref, wo_ref, bo_ref,
                             sel_ref, seld_ref, selb_ref, o_ref):
    C = wo_ref.shape[0]
    cdt = x_ref.dtype

    x2 = x_ref[0]                                       # (C, TM), caller dtype

    # ---- fused Q|K|V 1x1 conv on the MXU: (2C+8, C) @ (C, TM), f32 acc.
    # Weight rows are ordered [K | V | Q | zero-pad] so the slices below are
    # 128-aligned along sublanes.
    kvq = jnp.dot(wkvq_ref[...], x2, preferred_element_type=jnp.float32)
    k = kvq[0:C, :]                                     # (C, TM)  bk folded later
    v = kvq[C:2 * C, :] + bv_ref[...]                   # (C, TM)
    q = kvq[2 * C:2 * C + 1, :]                         # (1, TM)  bq dropped (exact)

    # ---- softmax over each length-N patch segment of the lane axis.
    # A single block-global max keeps exp() in range and is exact for the
    # per-segment softmax (shift invariance); per-segment maxima would only
    # matter for pathological (>~87) intra-block logit spreads.
    qmax = jnp.max(q, axis=1, keepdims=True)            # (1, 1)
    e = jnp.exp(q - qmax)                               # (1, TM), f32

    # Per-segment denominator as a tiny exact f32 matmul: (1, TM) @ (TM, TP).
    denom = jnp.dot(e, seld_ref[...], preferred_element_type=jnp.float32)
    inv_denom = pl.reciprocal(denom, approx=False)      # (1, TP)

    # ---- context[c, p] = sum_n k[c, p, n] * softmax(q)[p, n]
    # Weighted key sum over the patch axis as a matmul against the 0/1
    # selector (runs in the caller dtype on the MXU, f32 accumulation).
    ke = (k * e).astype(cdt)                            # (C, TM)
    ctx = jnp.dot(ke, sel_ref[...], preferred_element_type=jnp.float32)
    ctx = ctx * inv_denom + bk_ref[...]                 # (C, TP)  fold bk (exact)

    # Broadcast the context back over the patch axis: (C, TP) @ (TP, TM).
    # K = TP is tiny, so an exact f32 pass is essentially free on the MXU.
    ctx_b = jnp.dot(ctx, selb_ref[...], preferred_element_type=jnp.float32)

    out = jnp.maximum(v, 0.0) * ctx_b                   # (C, TM), f32 elementwise

    # ---- out_proj 1x1 conv on the MXU: (C, C) @ (C, TM), f32 accumulation.
    y = jnp.dot(wo_ref[...], out.astype(wo_ref.dtype),
                preferred_element_type=jnp.float32)
    y = y + bo_ref[...]                                 # (C, TM)
    o_ref[...] = y[None, :, :].astype(o_ref.dtype)


def _pick_tp(B, P, N, C, itemsize, target_bytes=1 << 20, min_steps=4):
    """Pick TP = patch rows per block.

    TP must divide P and TP*N must be a multiple of 128 (lane-dense blocks /
    stores) unless TP == P (full-extent block, always legal).  Prefer the
    largest TP whose x block stays under target_bytes, then back off so the
    grid keeps at least `min_steps` steps (v7x dual-TC + DMA pipeline).
    """
    divisors = [d for d in range(1, P + 1) if P % d == 0]
    aligned = [d for d in divisors if (d * N) % 128 == 0] or [P]
    fits = [d for d in aligned if d * N * C * itemsize <= target_bytes]
    tp = max(fits) if fits else min(aligned)
    smaller = sorted(d for d in aligned if d < tp)
    while B * (P // tp) < min_steps and smaller:
        tp = smaller.pop()
    return tp


def linear_self_attention(x, w_qkv, b_qkv, w_out, b_out, *, tp=None):
    """MobileViT-v2 LinearSelfAttention forward (eval: dropout = identity).

    x:     (B, C, P, N) NCHW activations (C = embed_dim, softmax over N).
    w_qkv: (1 + 2C, C)  qkv_proj Conv2d 1x1 weight (kernel dims squeezed);
           row 0 = query, rows 1..C = keys, rows 1+C.. = values.
    b_qkv: (1 + 2C,)
    w_out: (C, C)       out_proj Conv2d 1x1 weight.
    b_out: (C,)
    tp:    patch rows (of P) per grid step (None -> auto).
    """
    B, C, P, N = x.shape
    assert w_qkv.shape == (1 + 2 * C, C) and w_out.shape == (C, C)

    cdt = x.dtype
    itemsize = jnp.dtype(cdt).itemsize

    if tp is None:
        tp = _pick_tp(B, P, N, C, itemsize)
    assert P % tp == 0 and ((tp * N) % 128 == 0 or tp == P), \
        f"tp={tp} must divide P={P} with tp*N a multiple of 128 (or tp == P)"
    TM = tp * N
    grid = (B, P // tp)

    # (B, C, P, N) -> (B, C, P*N): contiguous view, no HBM traffic.
    x3 = x.reshape(B, C, P * N)

    # Weight prep (plain JAX glue, traced once).  Rows reordered to
    # [K | V | Q | zero-pad] so in-kernel row slices are 128-aligned.
    wq = w_qkv[0:1, :]
    wk = w_qkv[1:1 + C, :]
    wv = w_qkv[1 + C:1 + 2 * C, :]
    pad = jnp.zeros((7, C), dtype=w_qkv.dtype)
    wkvq = jnp.concatenate([wk, wv, wq, pad], axis=0).astype(cdt)   # (2C+8, C)
    wo = w_out.astype(cdt)                                          # (C, C) as-is
    bk = b_qkv[1:1 + C].astype(jnp.float32).reshape(C, 1)
    bv = b_qkv[1 + C:1 + 2 * C].astype(jnp.float32).reshape(C, 1)
    bo = b_out.astype(jnp.float32).reshape(C, 1)
    # b_qkv[0] (query bias) intentionally dropped: softmax shift invariance.

    # Static 0/1 patch-segment selectors (built once, VMEM-resident).
    m_seg = jnp.arange(TM, dtype=jnp.int32) // N                    # (TM,)
    p_ids = jnp.arange(tp, dtype=jnp.int32)                         # (TP,)
    sel = m_seg[:, None] == p_ids[None, :]                          # (TM, TP)
    sel_c = sel.astype(cdt)                 # weighted key-sum matmul (MXU dtype)
    sel_f = sel.astype(jnp.float32)         # exact softmax denominator
    selb_f = (p_ids[:, None] == m_seg[None, :]).astype(jnp.float32)  # (TP, TM)

    # VMEM budget: double-buffered in/out blocks + live f32 intermediates
    # (~8x an f32 block: qkv result, relu/context/broadcast/proj chains)
    # + weights + selectors.  Cap at 48 MiB (v7x has 64 MiB total).
    blk = C * TM * itemsize
    blk_f32 = C * TM * 4
    w_bytes = ((2 * C + 8) * C + C * C) * itemsize + 3 * C * 4
    sel_bytes = TM * max(tp, 128) * (itemsize + 4) + max(tp, 8) * TM * 4
    est = 4 * blk + 8 * blk_f32 + w_bytes + sel_bytes + (4 << 20)
    vmem_limit = int(min(48 << 20, max(32 << 20, est)))

    full = lambda a: pl.BlockSpec(a.shape, lambda b, j: (0,) * a.ndim)

    out3 = pl.pallas_call(
        _linear_self_attn_kernel,
        out_shape=jax.ShapeDtypeStruct((B, C, P * N), cdt),
        grid=grid,
        in_specs=[
            # If profiling shows the DMA exposed, add
            # pipeline_mode=pl.Buffered(3) here (one extra x tile of VMEM;
            # re-check the v7x budget first).
            pl.BlockSpec((1, C, TM), lambda b, j: (b, 0, j)),   # x slab
            full(wkvq),                                         # fused K|V|Q weights
            full(bk),
            full(bv),
            full(wo),
            full(bo),
            full(sel_c),
            full(sel_f),
            full(selb_f),
        ],
        out_specs=pl.BlockSpec((1, C, TM), lambda b, j: (b, 0, j)),
        compiler_params=pltpu.CompilerParams(
            # Blocks are fully independent -> both axes can shard across
            # v7x's two TensorCores; neutral on single-TC v5e/v6e.
            dimension_semantics=("parallel", "parallel"),
            vmem_limit_bytes=vmem_limit,
        ),
    )(x3, wkvq, bk, bv, wo, bo, sel_c, sel_f, selb_f)

    # (B, C, P*N) -> (B, C, P, N): contiguous view, no HBM traffic.
    return out3.reshape(B, C, P, N)


def _reference(x, w_qkv, b_qkv, w_out, b_out):
    # Pure-JAX f32 reference mirroring the PyTorch forward exactly.
    B, C, P, N = x.shape
    hp = jax.lax.Precision.HIGHEST
    xf = x.astype(jnp.float32)
    wqkv = w_qkv.astype(jnp.float32)
    bqkv = b_qkv.astype(jnp.float32)
    wo = w_out.astype(jnp.float32)
    bo = b_out.astype(jnp.float32)
    qkv = jnp.einsum('bchw,oc->bohw', xf, wqkv, precision=hp) \
        + bqkv[None, :, None, None]
    q = qkv[:, 0:1]
    k = qkv[:, 1:1 + C]
    v = qkv[:, 1 + C:]
    scores = jax.nn.softmax(q, axis=-1)
    ctx = jnp.sum(k * scores, axis=-1, keepdims=True)
    out = jax.nn.relu(v) * ctx
    return jnp.einsum('bchw,oc->bohw', out, wo, precision=hp) \
        + bo[None, :, None, None]


if __name__ == "__main__":
    embed_dim = 128    # C: keeps every matmul contraction dim = 128
    B, P, N = 4, 4, 64

    key = jax.random.PRNGKey(0)
    kx, kw1, kb1, kw2, kb2 = jax.random.split(key, 5)

    # bf16 activations / weights: bf16 MXU + half the HBM bytes (review item).
    dt = jnp.bfloat16
    x = jax.random.normal(kx, (B, embed_dim, P, N), dtype=jnp.float32).astype(dt)
    w_qkv = (0.1 * jax.random.normal(kw1, (1 + 2 * embed_dim, embed_dim),
                                     dtype=jnp.float32)).astype(dt)
    b_qkv = 0.1 * jax.random.normal(kb1, (1 + 2 * embed_dim,), dtype=jnp.float32)
    w_out = (0.1 * jax.random.normal(kw2, (embed_dim, embed_dim),
                                     dtype=jnp.float32)).astype(dt)
    b_out = 0.1 * jax.random.normal(kb2, (embed_dim,), dtype=jnp.float32)

    # tp=2 -> TM=128 lane-dense blocks, grid (4, 2) = 8 steps (exercises both
    # grid axes and the pipeline).  tp=None auto-picks tp=4 at these shapes.
    y = linear_self_attention(x, w_qkv, b_qkv, w_out, b_out, tp=2)
    y = jax.block_until_ready(y)

    y_ref = _reference(x, w_qkv, b_qkv, w_out, b_out)
    assert y.shape == (B, embed_dim, P, N)
    yf = y.astype(jnp.float32)
    max_err = float(jnp.max(jnp.abs(yf - y_ref)))
    assert jnp.allclose(yf, y_ref, atol=3e-2, rtol=3e-2), \
        f"mismatch vs reference: max abs err {max_err}"
    print("KERNEL_OK")
</pallas_src>

<mosaic_0001>
module attributes {stable_mosaic.version = 11 : i64} {
  func.func @_linear_self_attn_kernel(%arg0: i32, %arg1: i32, %arg2: memref<1x128x128xbf16, #tpu.memory_space<vmem>>, %arg3: memref<264x128xbf16, #tpu.memory_space<vmem>>, %arg4: memref<128x1xf32, #tpu.memory_space<vmem>>, %arg5: memref<128x1xf32, #tpu.memory_space<vmem>>, %arg6: memref<128x128xbf16, #tpu.memory_space<vmem>>, %arg7: memref<128x1xf32, #tpu.memory_space<vmem>>, %arg8: memref<128x2xbf16, #tpu.memory_space<vmem>>, %arg9: memref<128x2xf32, #tpu.memory_space<vmem>>, %arg10: memref<2x128xf32, #tpu.memory_space<vmem>>, %arg11: memref<1x128x128xbf16, #tpu.memory_space<vmem>>) attributes {dimension_semantics = [#tpu.dimension_semantics<parallel>, #tpu.dimension_semantics<parallel>], iteration_bounds = array<i64: 4, 2>, scalar_prefetch = 0 : i64, scratch_operands = 0 : i64, tpu.core_type = #tpu.core_type<tc>, window_params = [{transform_indices = @transform_0, window_bounds = array<i64: 1, 128, 128>}, {pipeline_mode = #tpu.pipeline_mode<synchronous>, transform_indices = @transform_1, window_bounds = array<i64: 264, 128>}, {pipeline_mode = #tpu.pipeline_mode<synchronous>, transform_indices = @transform_2, window_bounds = array<i64: 128, 1>}, {pipeline_mode = #tpu.pipeline_mode<synchronous>, transform_indices = @transform_3, window_bounds = array<i64: 128, 1>}, {pipeline_mode = #tpu.pipeline_mode<synchronous>, transform_indices = @transform_4, window_bounds = array<i64: 128, 128>}, {pipeline_mode = #tpu.pipeline_mode<synchronous>, transform_indices = @transform_5, window_bounds = array<i64: 128, 1>}, {pipeline_mode = #tpu.pipeline_mode<synchronous>, transform_indices = @transform_6, window_bounds = array<i64: 128, 2>}, {pipeline_mode = #tpu.pipeline_mode<synchronous>, transform_indices = @transform_7, window_bounds = array<i64: 128, 2>}, {pipeline_mode = #tpu.pipeline_mode<synchronous>, transform_indices = @transform_8, window_bounds = array<i64: 2, 128>}, {transform_indices = @transform_9, window_bounds = array<i64: 1, 128, 128>}]} {
    %c0 = arith.constant 0 : index
    %c0_0 = arith.constant 0 : index
    %c0_1 = arith.constant 0 : index
    %0 = vector.load %arg2[%c0, %c0_0, %c0_1] : memref<1x128x128xbf16, #tpu.memory_space<vmem>>, vector<1x128x128xbf16>
    %1 = vector.shape_cast %0 : vector<1x128x128xbf16> to vector<128x128xbf16>
    %c0_2 = arith.constant 0 : index
    %c0_3 = arith.constant 0 : index
    %2 = vector.load %arg3[%c0_2, %c0_3] : memref<264x128xbf16, #tpu.memory_space<vmem>>, vector<264x128xbf16>
    %cst = arith.constant dense<0.000000e+00> : vector<264x128xf32>
    %3 = tpu.matmul %2, %1, %cst {dimension_numbers = #tpu.dot_dimension_numbers<[1], [0], [0], [1], [0, 0, 1, 1], [], []>} : vector<264x128xbf16>, vector<128x128xbf16>, vector<264x128xf32> -> vector<264x128xf32>
    %4 = vector.extract_strided_slice %3 {offsets = [0, 0], sizes = [128, 128], strides = [1, 1]} : vector<264x128xf32> to vector<128x128xf32>
    %5 = vector.extract_strided_slice %3 {offsets = [128, 0], sizes = [128, 128], strides = [1, 1]} : vector<264x128xf32> to vector<128x128xf32>
    %c0_4 = arith.constant 0 : index
    %c0_5 = arith.constant 0 : index
    %6 = vector.load %arg5[%c0_4, %c0_5] : memref<128x1xf32, #tpu.memory_space<vmem>>, vector<128x1xf32>
    %7 = vector.broadcast %6 : vector<128x1xf32> to vector<128x128xf32>
    %8 = arith.addf %5, %7 : vector<128x128xf32>
    %9 = vector.extract_strided_slice %3 {offsets = [256, 0], sizes = [1, 128], strides = [1, 1]} : vector<264x128xf32> to vector<1x128xf32>
    %cst_6 = arith.constant dense<0xFF800000> : vector<1xf32>
    %10 = vector.multi_reduction <maximumf>, %9, %cst_6 [1] : vector<1x128xf32> to vector<1xf32>
    %11 = vector.shape_cast %10 : vector<1xf32> to vector<1x1xf32>
    %12 = vector.broadcast %11 : vector<1x1xf32> to vector<1x128xf32>
    %13 = arith.subf %9, %12 : vector<1x128xf32>
    %14 = math.exp %13 : vector<1x128xf32>
    %c0_7 = arith.constant 0 : index
    %c0_8 = arith.constant 0 : index
    %15 = vector.load %arg9[%c0_7, %c0_8] : memref<128x2xf32, #tpu.memory_space<vmem>>, vector<128x2xf32>
    %cst_9 = arith.constant dense<0.000000e+00> : vector<1x2xf32>
    %16 = tpu.matmul %14, %15, %cst_9 {dimension_numbers = #tpu.dot_dimension_numbers<[1], [0], [0], [1], [0, 0, 1, 1], [], []>} : vector<1x128xf32>, vector<128x2xf32>, vector<1x2xf32> -> vector<1x2xf32>
    %17 = tpu.reciprocal %16 : vector<1x2xf32> -> vector<1x2xf32>
    %18 = vector.broadcast %14 : vector<1x128xf32> to vector<128x128xf32>
    %19 = arith.mulf %4, %18 : vector<128x128xf32>
    %20 = arith.truncf %19 : vector<128x128xf32> to vector<128x128xbf16>
    %c0_10 = arith.constant 0 : index
    %c0_11 = arith.constant 0 : index
    %21 = vector.load %arg8[%c0_10, %c0_11] : memref<128x2xbf16, #tpu.memory_space<vmem>>, vector<128x2xbf16>
    %cst_12 = arith.constant dense<0.000000e+00> : vector<128x2xf32>
    %22 = tpu.matmul %20, %21, %cst_12 {dimension_numbers = #tpu.dot_dimension_numbers<[1], [0], [0], [1], [0, 0, 1, 1], [], []>} : vector<128x128xbf16>, vector<128x2xbf16>, vector<128x2xf32> -> vector<128x2xf32>
    %23 = vector.broadcast %17 : vector<1x2xf32> to vector<128x2xf32>
    %24 = arith.mulf %22, %23 : vector<128x2xf32>
    %c0_13 = arith.constant 0 : index
    %c0_14 = arith.constant 0 : index
    %25 = vector.load %arg4[%c0_13, %c0_14] : memref<128x1xf32, #tpu.memory_space<vmem>>, vector<128x1xf32>
    %26 = vector.broadcast %25 : vector<128x1xf32> to vector<128x2xf32>
    %27 = arith.addf %24, %26 : vector<128x2xf32>
    %c0_15 = arith.constant 0 : index
    %c0_16 = arith.constant 0 : index
    %28 = vector.load %arg10[%c0_15, %c0_16] : memref<2x128xf32, #tpu.memory_space<vmem>>, vector<2x128xf32>
    %cst_17 = arith.constant dense<0.000000e+00> : vector<128x128xf32>
    %29 = tpu.matmul %27, %28, %cst_17 {dimension_numbers = #tpu.dot_dimension_numbers<[1], [0], [0], [1], [0, 0, 1, 1], [], []>} : vector<128x2xf32>, vector<2x128xf32>, vector<128x128xf32> -> vector<128x128xf32>
    %cst_18 = arith.constant 0.000000e+00 : f32
    %30 = vector.broadcast %cst_18 : f32 to vector<128x128xf32>
    %31 = arith.maximumf %8, %30 : vector<128x128xf32>
    %32 = arith.mulf %31, %29 : vector<128x128xf32>
    %c0_19 = arith.constant 0 : index
    %c0_20 = arith.constant 0 : index
    %33 = vector.load %arg6[%c0_19, %c0_20] : memref<128x128xbf16, #tpu.memory_space<vmem>>, vector<128x128xbf16>
    %34 = arith.truncf %32 : vector<128x128xf32> to vector<128x128xbf16>
    %cst_21 = arith.constant dense<0.000000e+00> : vector<128x128xf32>
    %35 = tpu.matmul %33, %34, %cst_21 {dimension_numbers = #tpu.dot_dimension_numbers<[1], [0], [0], [1], [0, 0, 1, 1], [], []>} : vector<128x128xbf16>, vector<128x128xbf16>, vector<128x128xf32> -> vector<128x128xf32>
    %c0_22 = arith.constant 0 : index
    %c0_23 = arith.constant 0 : index
    %36 = vector.load %arg7[%c0_22, %c0_23] : memref<128x1xf32, #tpu.memory_space<vmem>>, vector<128x1xf32>
    %37 = vector.broadcast %36 : vector<128x1xf32> to vector<128x128xf32>
    %38 = arith.addf %35, %37 : vector<128x128xf32>
    %39 = vector.shape_cast %38 : vector<128x128xf32> to vector<1x128x128xf32>
    %40 = arith.truncf %39 : vector<1x128x128xf32> to vector<1x128x128xbf16>
    %c0_24 = arith.constant 0 : index
    %c0_25 = arith.constant 0 : index
    %c0_26 = arith.constant 0 : index
    %41 = vector.load %arg11[%c0_24, %c0_25, %c0_26] : memref<1x128x128xbf16, #tpu.memory_space<vmem>>, vector<1x128x128xbf16>
    tpu.vector_store %arg11[%c0_24, %c0_25, %c0_26], %40 {strides = array<i32>} : memref<1x128x128xbf16, #tpu.memory_space<vmem>>, vector<1x128x128xbf16>,
    return
  }
  func.func @transform_0(%arg0: i32, %arg1: i32) -> (i32, i32, i32) {
    %c0_i32 = arith.constant 0 : i32
    %c0_i32_0 = arith.constant 0 : i32
    return %arg0, %c0_i32, %arg1 : i32, i32, i32
  }
  func.func @transform_1(%arg0: i32, %arg1: i32) -> (i32, i32) {
    %c0_i32 = arith.constant 0 : i32
    %c0_i32_0 = arith.constant 0 : i32
    %c0_i32_1 = arith.constant 0 : i32
    return %c0_i32, %c0_i32_0 : i32, i32
  }
  func.func @transform_2(%arg0: i32, %arg1: i32) -> (i32, i32) {
    %c0_i32 = arith.constant 0 : i32
    %c0_i32_0 = arith.constant 0 : i32
    %c0_i32_1 = arith.constant 0 : i32
    return %c0_i32, %c0_i32_0 : i32, i32
  }
  func.func @transform_3(%arg0: i32, %arg1: i32) -> (i32, i32) {
    %c0_i32 = arith.constant 0 : i32
    %c0_i32_0 = arith.constant 0 : i32
    %c0_i32_1 = arith.constant 0 : i32
    return %c0_i32, %c0_i32_0 : i32, i32
  }
  func.func @transform_4(%arg0: i32, %arg1: i32) -> (i32, i32) {
    %c0_i32 = arith.constant 0 : i32
    %c0_i32_0 = arith.constant 0 : i32
    %c0_i32_1 = arith.constant 0 : i32
    return %c0_i32, %c0_i32_0 : i32, i32
  }
  func.func @transform_5(%arg0: i32, %arg1: i32) -> (i32, i32) {
    %c0_i32 = arith.constant 0 : i32
    %c0_i32_0 = arith.constant 0 : i32
    %c0_i32_1 = arith.constant 0 : i32
    return %c0_i32, %c0_i32_0 : i32, i32
  }
  func.func @transform_6(%arg0: i32, %arg1: i32) -> (i32, i32) {
    %c0_i32 = arith.constant 0 : i32
    %c0_i32_0 = arith.constant 0 : i32
    %c0_i32_1 = arith.constant 0 : i32
    return %c0_i32, %c0_i32_0 : i32, i32
  }
  func.func @transform_7(%arg0: i32, %arg1: i32) -> (i32, i32) {
    %c0_i32 = arith.constant 0 : i32
    %c0_i32_0 = arith.constant 0 : i32
    %c0_i32_1 = arith.constant 0 : i32
    return %c0_i32, %c0_i32_0 : i32, i32
  }
  func.func @transform_8(%arg0: i32, %arg1: i32) -> (i32, i32) {
    %c0_i32 = arith.constant 0 : i32
    %c0_i32_0 = arith.constant 0 : i32
    %c0_i32_1 = arith.constant 0 : i32
    return %c0_i32, %c0_i32_0 : i32, i32
  }
  func.func @transform_9(%arg0: i32, %arg1: i32) -> (i32, i32, i32) {
    %c0_i32 = arith.constant 0 : i32
    %c0_i32_0 = arith.constant 0 : i32
    return %arg0, %c0_i32, %arg1 : i32, i32, i32
  }
}

</mosaic_0001>

<bundles_post_ra>
// kernel: tpu_custom_call.1
= control target key start
LH: loop header
LB: loop body
LE: loop exit
PB: predicated region body
PF: predicated region fallthrough
CT: control target
= control target key end

     0   :  { %s3517_s0 = inlined_call_operand.vmem [shape: bf16[4,128,256], index: 0, kind: input, shape index: {}]   ;;  %s3518_s1 = inlined_call_operand.hbm [shape: bf16[264,128], index: 1, kind: input, shape index: {}]   ;;  %s3519_s2 = inlined_call_operand.vmem [shape: f32[128,1], index: 2, kind: input, shape index: {}]   ;;  %s3520_s3 = inlined_call_operand.vmem [shape: f32[128,1], index: 3, kind: input, shape index: {}]   ;;  %s3521_s4 = inlined_call_operand.vmem [shape: bf16[128,128], index: 4, kind: input, shape index: {}]   ;;  %s3522_s5 = inlined_call_operand.vmem [shape: f32[128,1], index: 5, kind: input, shape index: {}]   ;;  %s3523_s6 = inlined_call_operand.vmem [shape: bf16[128,2], index: 6, kind: input, shape index: {}]   ;;  %s3524_s7 = inlined_call_operand.vmem [shape: f32[128,2], index: 7, kind: input, shape index: {}]   ;;  %s3525_s8 = inlined_call_operand.vmem [shape: f32[2,128], index: 8, kind: input, shape index: {}]   ;;  %s3526_s9 = inlined_call_operand.hbm [shape: bf16[4,128,256], index: 9, kind: output, shape index: {}]  }
   0x1   :  { %3538 = sst [smem:[#allocation16_spill]] %s3526_s9 }
   0x2   :  { %14 = vsyncpa [#allocation4], 0 }
   0x3   :  { %15 = vsyncpa [#allocation5], 0 }
   0x4   :  { %17 = vsyncpa [#allocation5 + $0x1], 0  ;;  %s2849_s30 = smov 0   ;;  %s2851_s10 = smov 0  }
   0x5   :  { %s2853_s11 = smov 0   ;;  %s2855_s12 = smov 0  }
   0x6   :  { %s2857_s13 = smov 0   ;;  %s2859_s14 = smov 0  }
   0x7   :  { %s2861_s15 = smov 0   ;;  %s2863_s16 = smov 0  }
   0x8 LB: > { %3539 = sst [smem:[#allocation9_spill]] %s2758_s30  ;;  %s2044_s17 = sadd.s32 4294967295, %s2786_s16   ;;  %s2786_s16 = sphi %s2863_s16, %s23_s16   ;;  %s2782_s15 = sphi %s2861_s15, %s3571_s15   ;;  %s2778_s14 = sphi %s2859_s14, %s3570_s14   ;;  %s2774_s13 = sphi %s2857_s13, %s3569_s13   ;;  %s2770_s12 = sphi %s2855_s12, %s3568_s12   ;;  %s2766_s11 = sphi %s2853_s11, %s3567_s11   ;;  %s2762_s10 = sphi %s2851_s10, %s3566_s10   ;;  %s2758_s30 = sphi %s2849_s30, %s3565_s30  }
   0x9   : > { %3540 = sst [smem:[#allocation10_spill]] %s2770_s12  ;;  %s2045_s18 = sadd.s32 4294967294, %s2786_s16  }
   0xa   : > { %s32_s19 = sadd.s32 1, %s2778_s14  ;;  %s35_s20 = sadd.s32 1, %s2782_s15 }
   0xb   : > { %p33_p0 = scmp.ge.s32.totalorder %s32_s19, 2  ;;  %s44_s21 = sadd.s32 1, %s2766_s11 }
   0xc   : > { %p51_p1 = scmp.ne.s32.totalorder %s2766_s11, %s2762_s10  ;;  %p52_p2 = scmp.eq.s32.totalorder %s2786_s16, 0 }
   0xd   : > { %s3573_s19 = smov (%p33_p0, %s32_s19), 0  ;;  %s3575_s20 = smov (!%p33_p0, %s35_s20), %s2782_s15 }
   0xe   : > { %3541 = sst [smem:[#allocation11_spill]] %s3573_s19  ;;  %s40_s22 = ssub.s32 %s2778_s14, %s3573_s19 }
   0xf   : > { %p2902_p3 = por %p52_p2, %p51_p1  ;;  %p37_p4 = scmp.ge.s32.totalorder %s3575_s20, 4 }
  0x10   : > { %p251_p5 = scmp.eq.s32.totalorder %s2044_s17, 7  ;;  %p256_p6 = scmp.ne.s32.totalorder %s2762_s10, %s2758_s30 }
  0x11   : > { %s3542_s23 = scalar_select %p2902_p3, 1, 0 }
  0x12   : > { %p257_p7 = scmp.eq.s32.totalorder %s2045_s18, 7  ;;  %s3577_s20 = smov (%p37_p4, %s3575_s20), 0 }
  0x13   : > { %3543 = sst [smem:[#allocation12_spill]] %s3577_s20  ;;  %p2910_p8 = por %p251_p5, %p51_p1 }
  0x14   : > { %p2914_p9 = por %p257_p7, %p256_p6  ;;  %s39_s26 = ssub.s32 %s2782_s15, %s3577_s20 }
  0x15   : > { %s3544_s24 = scalar_select %p2910_p8, 1, 0 }
  0x16   : > { %s3546_s25 = scalar_select %p2914_p9, 1, 0 }
  0x17   : > { %3545 = sst [smem:[#allocation13_spill]] %s3544_s24  ;;  %p2046_p10 = scmp.ge.s32.totalorder %s2786_s16, 1 }
  0x18   : > { %3547 = sst [smem:[#allocation14_spill]] %s3546_s25  ;;  %s41_s27 = sor.u32 %s40_s22, %s39_s26 }
  0x19   : > { %p264_p11 = scmp.lt.s32.totalorder %s2786_s16, 9  ;;  %p42_p12 = scmp.eq.s32.totalorder %s41_s27, 0 }
  0x1a   : > { %p2926_p0 = scmp.eq.s32.totalorder %s2044_s17, 0  ;;  %s2788_s19 = smov [#allocation3]  }
  0x1b   : > { %p2922_p13 = pnand %p2046_p10, %p264_p11  ;;  %s276_s20 = sshll.u32 %s2788_s19, 4  ;;  %s277_s20 = int_to_ptr.vmem [resolvable:$true] %s276_s20 }
  0x1c   : > { %s3549_s29 = scalar_select %p2926_p0, 1, 0 }
  0x1d   : > { %s3548_s28 = scalar_select %p2922_p13, 1, 0 }
  0x1e   : > { %s2931_s18 = scalar_select %p42_p12, %s2766_s11, %s44_s21  }
  0x1f   : > { %p2528_p1 = pneg %p2922_p13  ;;  %s2660_s17 = scalar_lea.hbm %s3518_s1, 2112 }
  0x20   : > { %3550 = sst [smem:[#allocation15_spill]] %s2931_s18  ;;  %p2661_p4 = scmp.ne.s32.totalorder %s3518_s1, %s2660_s17 }
  0x21   : > { %p2937_p2 = pnand %p2926_p0, %p2528_p1  ;;  %p2667_p10 = scmp.lt.u32.totalorder %s2660_s17, %s3518_s1 }
  0x23   : > { %p2662_p5 = pneg %p2937_p2 }
  0x25   : > { %p2663_p6 = pnand %p2662_p5, %p2661_p4 }
  0x27   : > { %p2664_p7 = pneg %p2663_p6 }
  0x29   : > { %p2669_p11 = pnand %p2667_p10, %p2664_p7 }
  0x2b   : > { %2672 = shalt.err (!%p2669_p11)
}
  0x2c   : > { %s2673_s18 = scalar_lea.vmem %s277_s20, 2112  ;;  %p2681_p8 = scmp.lt.s32.totalorder %s277_s20, %s277_s20 }
  0x2d   : > { %p2674_p12 = scmp.ne.s32.totalorder %s277_s20, %s2673_s18  ;;  %p2682_p0 = scmp.lt.s32.totalorder %s2673_s18, %s2673_s18 }
  0x2f   : > { %p2676_p1 = pnand %p2674_p12, %p2662_p5  ;;  %p2683_p13 = por %p2682_p0, %p2681_p8 }
  0x31   : > { %p2677_p9 = pneg %p2676_p1 }
  0x33   : > { %p2684_p3 = pnand %p2683_p13, %p2677_p9 }
  0x35   : > { %2687 = shalt.err (!%p2684_p3)
}
  0x36   : > { %s2789_s30 = smov 64   ;;  %s2790_s25 = smov 4  }
  0x37   : > { %2531 = dma.hbm_to_vmem [thread:$0]  (!%p2937_p2), %s3518_s1, 2112, %s277_s20, [#allocation4], %s2789_s30, %s2789_s30, %s2790_s25  }
  0x38   : > { %p2048_p4 = scmp.ge.s32.totalorder %s2786_s16, 8 }
  0x39   : > { %p3552_p6 = scmp.ne.s32.totalorder (!%p2048_p4), %s3542_s23, 0 }
  0x3a   : > { %307 = sbr.rel (%p2048_p4) target bundleno = 81 (0x51), region = 48 }
  0x41   : > { %310 = sbr.rel (!%p3552_p6) target bundleno = 81 (0x51), region = 52  ;;  %s312_s18 = sand.u32 (%p3552_p6), 1, %s2766_s11  }
  0x42   : > { %s2050_s17 = sshll.u32 (%p3552_p6), %s2782_s15, 5  ;;  %s2049_s19 = sshll.u32 (%p3552_p6), %s312_s18, 6 }
  0x43   : > { %s316_s21 = sadd.s32 (%p3552_p6), %s2778_s14, %s2050_s17  ;;  %s314_s20 = scalar_lea.vmem (%p3552_p6), [#allocation2], %s2049_s19 }
  0x44   : > { %s2051_s9 = sshll.u32 (%p3552_p6), %s316_s21, 2 }
  0x45   : > { %s2966_s12 = scalar_lea.vmem (%p3552_p6), %s3517_s0, %s2051_s9 }
  0x46   : > { %v334_v0 = vld [vmem:[%s2966_s12] sm:$0xf] (%p3552_p6)  ;;  %v336_v1 = vld [vmem:[%s2966_s12 + $0x8] sm:$0xf] (%p3552_p6)  ;;  %v338_v2 = vld [vmem:[%s2966_s12 + $0x10] sm:$0xf] (%p3552_p6) }
  0x47   : > { %335 = vst [vmem:[%s314_s20] sm:$0xf] (%p3552_p6), %v334_v0  ;;  %337 = vst [vmem:[%s314_s20 + $0x4] sm:$0xf] (%p3552_p6), %v336_v1  ;;  %v340_v3 = vld [vmem:[%s2966_s12 + $0x18] sm:$0xf] (%p3552_p6) }
  0x48   : > { %339 = vst [vmem:[%s314_s20 + $0x8] sm:$0xf] %v338_v2  ;;  %v342_v4 = vld [vmem:[%s2966_s12 + $0x20] sm:$0xf]  ;;  %v344_v5 = vld [vmem:[%s2966_s12 + $0x28] sm:$0xf] }
  0x49   : > { %341 = vst [vmem:[%s314_s20 + $0xc] sm:$0xf] %v340_v3  ;;  %343 = vst [vmem:[%s314_s20 + $0x10] sm:$0xf] %v342_v4  ;;  %v346_v6 = vld [vmem:[%s2966_s12 + $0x30] sm:$0xf] }
  0x4a   : > { %345 = vst [vmem:[%s314_s20 + $0x14] sm:$0xf] %v344_v5  ;;  %v348_v7 = vld [vmem:[%s2966_s12 + $0x38] sm:$0xf]  ;;  %v350_v8 = vld [vmem:[%s2966_s12 + $0x40] sm:$0xf] }
  0x4b   : > { %347 = vst [vmem:[%s314_s20 + $0x18] sm:$0xf] %v346_v6  ;;  %349 = vst [vmem:[%s314_s20 + $0x1c] sm:$0xf] %v348_v7  ;;  %v352_v9 = vld [vmem:[%s2966_s12 + $0x48] sm:$0xf] }
  0x4c   : > { %351 = vst [vmem:[%s314_s20 + $0x20] sm:$0xf] %v350_v8  ;;  %v354_v10 = vld [vmem:[%s2966_s12 + $0x50] sm:$0xf]  ;;  %v356_v11 = vld [vmem:[%s2966_s12 + $0x58] sm:$0xf] }
  0x4d   : > { %353 = vst [vmem:[%s314_s20 + $0x24] sm:$0xf] %v352_v9  ;;  %355 = vst [vmem:[%s314_s20 + $0x28] sm:$0xf] %v354_v10  ;;  %v358_v12 = vld [vmem:[%s2966_s12 + $0x60] sm:$0xf] }
  0x4e   : > { %357 = vst [vmem:[%s314_s20 + $0x2c] sm:$0xf] %v356_v11  ;;  %v360_v13 = vld [vmem:[%s2966_s12 + $0x68] sm:$0xf]  ;;  %v362_v14 = vld [vmem:[%s2966_s12 + $0x70] sm:$0xf] }
  0x4f   : > { %359 = vst [vmem:[%s314_s20 + $0x30] sm:$0xf] %v358_v12  ;;  %361 = vst [vmem:[%s314_s20 + $0x34] sm:$0xf] %v360_v13  ;;  %v364_v15 = vld [vmem:[%s2966_s12 + $0x78] sm:$0xf] }
  0x50   : > { %363 = vst [vmem:[%s314_s20 + $0x38] sm:$0xf] %v362_v14  ;;  %365 = vst [vmem:[%s314_s20 + $0x3c] sm:$0xf] %v364_v15 }
  0x51 PF: > { %p3553_p3 = scmp.ne.s32.totalorder %s3548_s28, 0 }
  0x52   : > { %s426_s9 = sand.u32 (!%p3553_p3), 1, %s2762_s10   ;;  %p3554_p8 = scmp.ne.s32.totalorder (!%p3553_p3), %s3549_s29, 0 }
  0x53   : > { %423 = sbr.rel (%p3553_p3) target bundleno = 1382 (0x566), region = 93  ;;  %s2989_s23 = sshll.u32 (!%p3553_p3), %s426_s9, 6 }
  0x54   : > { %s2992_s24 = scalar_lea.vmem (!%p3553_p3), [#allocation2], %s2989_s23 }
  0x5a   : > { %2749 = dma.done.wait (%p3554_p8), [#allocation4], 2112  }
  0x5b   : > { %2751 = vsyncadd (%p3554_p8), [#allocation4], 4294965184  ;;  %v2791_v16 = vmov 0.0   ;;  %vm2792_vm0 = vmmov 0   ;;  %v2793_v17 = vmov 0   ;;  %v2615_v18 = vld [vmem:[%s2992_s24] sm:$0xff]  }
  0x5c   : > { %2289 = vmatprep.subr.bf16.mxu0 %v2791_v16  ;;  %2305 = vmatprep.mubr.msk.bf16.mxu0 %vm2792_vm0, %v2791_v16  ;;  %v2616_v19 = vld [vmem:[%s2992_s24 + $0x8] sm:$0xff]   ;;  %v2617_v20 = vld [vmem:[%s2992_s24 + $0x10] sm:$0xff]   ;;  %v2618_v21 = vld [vmem:[%s2992_s24 + $0x18] sm:$0xff]   ;;  %vm943_vm1 = vcmask 1040384   ;;  %vm1408_vm2 = vcmask 1041408   ;;  %vm1359_vm3 = vcmask 15360  }
  0x5d   : > { %2614 = vset.pattern.permute.xlu1 %v2793_v17  ;;  %2613 = vset.pattern.permute.xlu0 %v2793_v17  ;;  %v2619_v22 = vld [vmem:[%s2992_s24 + $0x20] sm:$0xff]   ;;  %v2620_v23 = vld [vmem:[%s2992_s24 + $0x28] sm:$0xff]   ;;  %v2621_v25 = vld [vmem:[%s2992_s24 + $0x30] sm:$0xff]   ;;  %s3443_s17 = scalar_lea.vmem [#allocation6], %s2989_s23  ;;  %s3555_s23 = sld [smem:[#allocation10_spill]] }
  0x5e   : > { %2405 = vmatprep.mubr.msk.f32.mxu1 %vm2792_vm0, %v2791_v16  ;;  %2290 = vmatpush3.bf16.msra.mxu0 %v2615_v18  ;;  %v1247_v24 = vld [vmem:[%s3519_s2 + $0x8] sm:$0xff]  ;;  %v1248_v26 = vld [vmem:[%s3519_s2 + $0x10] sm:$0xff]  ;;  %v2622_v27 = vld [vmem:[%s2992_s24 + $0x38] sm:$0xff]   ;;  %s2131_s19 = sshll.u32 %s2774_s13, 5  ;;  %s1949_s22 = sshll.u32 %s3443_s17, 4  ;;  %s3454_s22 = int_to_ptr.vmem [resolvable:$true] %s1949_s22 }
  0x5f   : > { %2291 = vmatprep.subr.bf16.mxu0 %v2791_v16  ;;  %1269 = vperm.xlu1 %2614, %v1247_v24   ;;  %v1249_v28 = vld [vmem:[%s3519_s2 + $0x18] sm:$0xff]  ;;  %v2623_v29 = vld [vmem:[#allocation3] sm:$0xff]   ;;  %v1251_v31 = vld [vmem:[%s3519_s2 + $0x28] sm:$0xff]  ;;  %s3556_s20 = sld [smem:[#allocation13_spill]]  ;;  %s3557_s28 = sld [smem:[#allocation16_spill]] }
  0x60   : > { %v1250_v30 = vld [vmem:[%s3519_s2 + $0x20] sm:$0xff]  ;;  %v2624_v32 = vld [vmem:[#allocation3 + $0x8] sm:$0xff]   ;;  %v1252_v33 = vld [vmem:[%s3519_s2 + $0x30] sm:$0xff]  ;;  %s3465_s30 = scalar_lea.sflag [#allocation5], %s426_s9  ;;  %s2688_s25 = scalar_lea.vmem %s3454_s22, 1024 }
  0x61   : > { %v1253_v34 = vld [vmem:[%s3519_s2 + $0x38] sm:$0xff]  ;;  %v2625_v35 = vld [vmem:[#allocation3 + $0x10] sm:$0xff]   ;;  %v1254_v36 = vld [vmem:[%s3519_s2 + $0x40] sm:$0xff]  ;;  %p2689_p9 = scmp.ne.s32.totalorder %s3454_s22, %s2688_s25  ;;  %s2795_s26 = smov [#allocation6]  }
  0x62   : > { %2292 = vmatpush3.bf16.msra.mxu0 %v2616_v19  ;;  %v1255_v37 = vld [vmem:[%s3519_s2 + $0x48] sm:$0xff]  ;;  %v2626_v38 = vld [vmem:[#allocation3 + $0x18] sm:$0xff]   ;;  %v1256_v39 = vld [vmem:[%s3519_s2 + $0x50] sm:$0xff]  ;;  %s2692_s27 = sshll.u32 %s2795_s26, 4  ;;  %s2693_s27 = int_to_ptr.vmem [resolvable:$false] %s2692_s27 }
  0x63   : > { %2293 = vmatprep.subr.bf16.mxu0 %v2791_v16  ;;  %1274 = vperm.xlu1 %2614, %v1248_v26   ;;  %v1257_v40 = vld [vmem:[%s3519_s2 + $0x58] sm:$0xff]  ;;  %v2627_v41 = vld [vmem:[#allocation3 + $0x20] sm:$0xff]   ;;  %v1260_v43 = vld [vmem:[%s3519_s2 + $0x70] sm:$0xff]  ;;  %s1946_s21 = sadd.s32 %s3555_s23, %s2131_s19  ;;  %s2694_s18 = scalar_lea.vmem %s2693_s27, 2048 }
  0x64   : > { %v1258_v42 = vld [vmem:[%s3519_s2 + $0x60] sm:$0xff]  ;;  %v2628_v44 = vld [vmem:[#allocation3 + $0x28] sm:$0xff]   ;;  %v833_v46 = vld [vmem:[%s3520_s3 + $0x10] sm:$0xff]  ;;  %s2132_s24 = sshll.u32 %s1946_s21, 6  ;;  %p2695_p5 = scmp.lt.s32.totalorder %s3454_s22, %s2693_s27 }
  0x65   : > { %v831_v45 = vld [vmem:[%s3520_s3] sm:$0xff]  ;;  %v2629_v47 = vld [vmem:[#allocation3 + $0x30] sm:$0xff]   ;;  %v2630_v50 = vld [vmem:[#allocation3 + $0x38] sm:$0xff]   ;;  %s3459_s29 = scalar_lea.hbm %s3557_s28, %s2132_s24  ;;  %p3558_p13 = scmp.ne.s32.totalorder %s3556_s20, 0 }
  0x66   : > { %2294 = vmatpush3.bf16.msra.mxu0 %v2617_v20  ;;  %v835_v48 = vld [vmem:[%s3520_s3 + $0x20] sm:$0xff]  ;;  %v837_v49 = vld [vmem:[%s3520_s3 + $0x30] sm:$0xff]  ;;  %v2632_v56 = vld [vmem:[#allocation3 + $0x48] sm:$0xff]   ;;  %p2696_p7 = scmp.lt.s32.totalorder %s2694_s18, %s2688_s25 }
  0x67   : > { %2295 = vmatprep.subr.bf16.mxu0 %v2791_v16  ;;  %1279 = vperm.xlu1 %2614, %v1249_v28   ;;  %v839_v51 = vld [vmem:[%s3520_s3 + $0x40] sm:$0xff]  ;;  %v841_v52 = vld [vmem:[%s3520_s3 + $0x50] sm:$0xff]  ;;  %v2634_v58 = vld [vmem:[#allocation3 + $0x58] sm:$0xff]   ;;  %p2690_p0 = pnand %p2689_p9, %p3558_p13 }
  0x68   : > { %v2631_v53 = vld [vmem:[#allocation3 + $0x40] sm:$0xff]   ;;  %v845_v55 = vld [vmem:[%s3520_s3 + $0x70] sm:$0xff]  ;;  %v2636_v60 = vld [vmem:[#allocation3 + $0x68] sm:$0xff]   ;;  %p2697_p10 = por %p2696_p7, %p2695_p5 }
  0x69   : > { %v843_v54 = vld [vmem:[%s3520_s3 + $0x60] sm:$0xff]  ;;  %v2633_v57 = vld [vmem:[#allocation3 + $0x50] sm:$0xff]   ;;  %v2638_v62 = vld [vmem:[#allocation3 + $0x78] sm:$0xff]   ;;  %p2691_p2 = pneg %p2690_p0 }
  0x6a   : > { %2296 = vmatpush3.bf16.msra.mxu0 %v2618_v21  ;;  %v2635_v59 = vld [vmem:[#allocation3 + $0x60] sm:$0xff]   ;;  %v2637_v61 = vld [vmem:[#allocation3 + $0x70] sm:$0xff]  }
  0x6b   : > { %2297 = vmatprep.subr.bf16.mxu0 %v2791_v16  ;;  %1284 = vperm.xlu1 %2614, %v1250_v30   ;;  %v2639_v63 = vld [vmem:[#allocation3 + $0x80] ss:$0 sps:$4 sm:$0xff]   ;;  %p2698_p11 = pnand %p2697_p10, %p2691_p2 }
  0x6e   : > { %2298 = vmatpush3.bf16.msra.mxu0 %v2619_v22 }
  0x6f   : > { %2299 = vmatprep.subr.bf16.mxu0 %v2791_v16  ;;  %1289 = vperm.xlu1 %2614, %v1251_v31  }
  0x72   : > { %2300 = vmatpush3.bf16.msra.mxu0 %v2620_v23 }
  0x73   : > { %2301 = vmatprep.subr.bf16.mxu0 %v2791_v16  ;;  %1294 = vperm.xlu1 %2614, %v1252_v33   ;;  %v950_v33 = vld [vmem:[%s3524_s7] sm:$0xff] }
  0x76   : > { %2302 = vmatpush3.bf16.msra.mxu0 %v2621_v25 }
  0x77   : > { %2303 = vmatprep.subr.bf16.mxu0 %v2791_v16  ;;  %1299 = vperm.xlu1 %2614, %v1253_v34   ;;  %v951_v34 = vld [vmem:[%s3524_s7 + $0x8] sm:$0xff] }
  0x7a   : > { %2304 = vmatpush3.bf16.msra.mxu0 %v2622_v27 }
  0x7b   : > { %1304 = vperm.xlu1 %2614, %v1254_v36  }
  0x7d   : > { %2306 = vmatmul.mubr.bf16.vlgmr.msra.gmra.mrb[0].mxu0 %v2623_v29 }
  0x7e   : > { %2309 = vmatprep.mubr.msk.bf16.mxu0 %vm2792_vm0, %v2791_v16 }
  0x7f   : > { %1309 = vperm.xlu1 %2614, %v1255_v37   ;;  %v2794_v37 = vmov 0.0|0.0  }
  0x80   : > { %2498 = vmatprep.subr.bf16.mxu1 %v2794_v37 }
  0x83   : > { %1314 = vperm.xlu1 %2614, %v1256_v39   ;;  %v953_v39 = vld [vmem:[%s3524_s7 + $0x18] sm:$0xff] }
  0x85   : > { %2310 = vmatmul.mubr.bf16.gmra.mrb[4].mxu0 %v2624_v32 }
  0x86   : > { %2313 = vmatprep.mubr.msk.bf16.mxu0 %vm2792_vm0, %v2791_v16 }
  0x87   : > { %1319 = vperm.xlu1 %2614, %v1257_v40  }
  0x8b   : > { %1324 = vperm.xlu1 %2614, %v1258_v42  }
  0x8d   : > { %2314 = vmatmul.mubr.bf16.gmra.mrb[8].mxu0 %v2625_v35  ;;  %v952_v35 = vld [vmem:[%s3524_s7 + $0x10] sm:$0xff] }
  0x8e   : > { %2317 = vmatprep.mubr.msk.bf16.mxu0 %vm2792_vm0, %v2791_v16  ;;  %v2502_v42 = vpack.c.bf16 %v953_v39, %v952_v35  ;;  %v960_v39 = vld [vmem:[%s3524_s7 + $0x50] sm:$0xff] }
  0x8f   : > { %1334 = vperm.xlu1 %2614, %v1260_v43   ;;  %v954_v43 = vld [vmem:[%s3524_s7 + $0x20] sm:$0xff] }
  0x93   : > { %849 = vperm.xlu1 %2614, %v831_v45  }
  0x95   : > { %2318 = vmatmul.mubr.bf16.gmra.mrb[12].mxu0 %v2626_v38  ;;  %v2499_v38 = vpack.c.bf16 %v951_v34, %v950_v33 }
  0x96   : > { %2321 = vmatprep.mubr.msk.bf16.mxu0 %vm2792_vm0, %v2791_v16 }
  0x97   : > { %859 = vperm.xlu1 %2614, %v833_v46   ;;  %2500 = vmatpush3.bf16.msra.mxu1 %v2499_v38 }
  0x98   : > { %2501 = vmatprep.subr.bf16.mxu1 %v2794_v37 }
  0x9b   : > { %869 = vperm.xlu1 %2614, %v835_v48   ;;  %2503 = vmatpush3.bf16.msra.mxu1 %v2502_v42  ;;  %v957_v48 = vld [vmem:[%s3524_s7 + $0x38] sm:$0xff] }
  0x9c   : > { %2504 = vmatprep.subr.bf16.mxu1 %v2794_v37 }
  0x9d   : > { %2322 = vmatmul.mubr.bf16.gmra.mrb[16].mxu0 %v2627_v41 }
  0x9e   : > { %2325 = vmatprep.mubr.msk.bf16.mxu0 %vm2792_vm0, %v2791_v16 }
  0x9f   : > { %879 = vperm.xlu1 %2614, %v837_v49  }
  0xa3   : > { %889 = vperm.xlu1 %2614, %v839_v51  }
  0xa5   : > { %2326 = vmatmul.mubr.bf16.gmra.mrb[20].mxu0 %v2628_v44  ;;  %v955_v44 = vld [vmem:[%s3524_s7 + $0x28] sm:$0xff] }
  0xa6   : > { %2329 = vmatprep.mubr.msk.bf16.mxu0 %vm2792_vm0, %v2791_v16  ;;  %v2505_v45 = vpack.c.bf16 %v955_v44, %v954_v43  ;;  %v962_v43 = vld [vmem:[%s3524_s7 + $0x60] sm:$0xff]  ;;  %v963_v44 = vld [vmem:[%s3524_s7 + $0x68] sm:$0xff] }
  0xa7   : > { %899 = vperm.xlu1 %2614, %v841_v52  }
  0xa8   : > { %2506 = vmatpush3.bf16.msra.mxu1 %v2505_v45  ;;  %v1246_v45 = vld [vmem:[%s3519_s2] sm:$0xff] }
  0xa9   : > { %2507 = vmatprep.subr.bf16.mxu1 %v2794_v37 }
  0xab   : > { %909 = vperm.xlu1 %2614, %v843_v54   ;;  %v959_v54 = vld [vmem:[%s3524_s7 + $0x48] sm:$0xff] }
  0xad   : > { %2330 = vmatmul.mubr.bf16.gmra.mrb[24].mxu0 %v2629_v47  ;;  %v956_v47 = vld [vmem:[%s3524_s7 + $0x30] sm:$0xff] }
  0xae   : > { %2333 = vmatprep.mubr.msk.bf16.mxu0 %vm2792_vm0, %v2791_v16  ;;  %v2508_v52 = vpack.c.bf16 %v957_v48, %v956_v47  ;;  %v2517_v47 = vpack.c.bf16 %v963_v44, %v962_v43  ;;  %v964_v48 = vld [vmem:[%s3524_s7 + $0x70] sm:$0xff]  ;;  %v1626_v43 = vld [vmem:[%s3522_s5 + $0x68] sm:$0xff] }
  0xaf   : > { %919 = vperm.xlu1 %2614, %v845_v55   ;;  %v1627_v44 = vld [vmem:[%s3522_s5 + $0x70] sm:$0xff] }
  0xb0   : > { %2509 = vmatpush3.bf16.msra.mxu1 %v2508_v52 }
  0xb1   : > { %2510 = vmatprep.subr.bf16.mxu1 %v2794_v37 }
  0xb5   : > { %2334 = vmatmul.mubr.bf16.gmra.mrb[28].mxu0 %v2630_v50 }
  0xb6   : > { %2337 = vmatprep.mubr.msk.bf16.mxu0 %vm2792_vm0, %v2791_v16 }
  0xbd   : > { %2338 = vmatmul.mubr.bf16.gmra.mrb[32].mxu0 %v2631_v53  ;;  %v958_v53 = vld [vmem:[%s3524_s7 + $0x40] sm:$0xff] }
  0xbe   : > { %2341 = vmatprep.mubr.msk.bf16.mxu0 %vm2792_vm0, %v2791_v16  ;;  %v2511_v55 = vpack.c.bf16 %v959_v54, %v958_v53  ;;  %v2640_v53 = vld [vmem:[%s3523_s6] sm:$0xff]   ;;  %v832_v54 = vld [vmem:[%s3520_s3 + $0x8] sm:$0xff] }
  0xc0   : > { %2512 = vmatpush3.bf16.msra.mxu1 %v2511_v55  ;;  %v834_v55 = vld [vmem:[%s3520_s3 + $0x18] sm:$0xff] }
  0xc1   : > { %2513 = vmatprep.subr.bf16.mxu1 %v2794_v37 }
  0xc5   : > { %2342 = vmatmul.mubr.bf16.gmra.mrb[36].mxu0 %v2632_v56 }
  0xc6   : > { %2345 = vmatprep.mubr.msk.bf16.mxu0 %vm2792_vm0, %v2791_v16 }
  0xcd   : > { %2346 = vmatmul.mubr.bf16.gmra.mrb[40].mxu0 %v2633_v57 }
  0xce   : > { %2349 = vmatprep.mubr.msk.bf16.mxu0 %vm2792_vm0, %v2791_v16 }
  0xd5   : > { %2350 = vmatmul.mubr.bf16.gmra.mrb[44].mxu0 %v2634_v58 }
  0xd6   : > { %2353 = vmatprep.mubr.msk.bf16.mxu0 %vm2792_vm0, %v2791_v16 }
  0xdd   : > { %2354 = vmatmul.mubr.bf16.gmra.mrb[48].mxu0 %v2635_v59 }
  0xde   : > { %2357 = vmatprep.mubr.msk.bf16.mxu0 %vm2792_vm0, %v2791_v16 }
  0xe5   : > { %2358 = vmatmul.mubr.bf16.gmra.mrb[52].mxu0 %v2636_v60 }
  0xe6   : > { %2361 = vmatprep.mubr.msk.bf16.mxu0 %vm2792_vm0, %v2791_v16 }
  0xed   : > { %2362 = vmatmul.mubr.bf16.gmra.mrb[56].mxu0 %v2637_v61 }
  0xee   : > { %2365 = vmatprep.mubr.msk.bf16.mxu0 %vm2792_vm0, %v2791_v16 }
  0xf5   : > { %2366 = vmatmul.mubr.bf16.gmra.mrb[60].mxu0 %v2638_v62 }
  0xf6   : > { %2369 = vmatprep.mubr.msk.bf16.mxu0 %vm2792_vm0, %v2791_v16 }
  0xfd   : > { %2370 = vmatmul.mubr.bf16.gmra.mrb[64].mxu0 %v2639_v63 }
 0x150   : > { %v3113_v0 = vpop.f32.mrb[0].mxu0 }
 0x151   : > { %v2307_v1 = vpop.f32.mrb[1].mxu0 }
 0x152   : > { %v3115_v2 = vpop.f32.mrb[2].mxu0 }
 0x153   : > { %v2308_v3 = vpop.f32.mrb[3].mxu0 }
 0x158   : > { %v3117_v4 = vpop.f32.mrb[4].mxu0 }
 0x159   : > { %v2311_v5 = vpop.f32.mrb[5].mxu0 }
 0x15a   : > { %v3119_v6 = vpop.f32.mrb[6].mxu0 }
 0x15b   : > { %v2312_v7 = vpop.f32.mrb[7].mxu0 }
 0x160   : > { %v3121_v8 = vpop.f32.mrb[8].mxu0 }
 0x161   : > { %v2315_v9 = vpop.f32.mrb[9].mxu0 }
 0x162   : > { %v3123_v10 = vpop.f32.mrb[10].mxu0 }
 0x163   : > { %v2316_v11 = vpop.f32.mrb[11].mxu0 }
 0x168   : > { %v3125_v12 = vpop.f32.mrb[12].mxu0 }
 0x169   : > { %v2319_v13 = vpop.f32.mrb[13].mxu0 }
 0x16a   : > { %v3127_v14 = vpop.f32.mrb[14].mxu0 }
 0x16b   : > { %v2320_v15 = vpop.f32.mrb[15].mxu0 }
 0x170   : > { %v3129_v16 = vpop.f32.mrb[16].mxu0 }
 0x171   : > { %v2323_v17 = vpop.f32.mrb[17].mxu0 }
 0x172   : > { %v3131_v18 = vpop.f32.mrb[18].mxu0 }
 0x173   : > { %v2324_v19 = vpop.f32.mrb[19].mxu0 }
 0x178   : > { %v3133_v20 = vpop.f32.mrb[20].mxu0 }
 0x179   : > { %v2327_v21 = vpop.f32.mrb[21].mxu0 }
 0x17a   : > { %v3135_v22 = vpop.f32.mrb[22].mxu0 }
 0x17b   : > { %v2328_v23 = vpop.f32.mrb[23].mxu0 }
 0x180   : > { %v3137_v24 = vpop.f32.mrb[24].mxu0 }
 0x181   : > { %v2331_v25 = vpop.f32.mrb[25].mxu0 }
 0x182   : > { %v3139_v26 = vpop.f32.mrb[26].mxu0 }
 0x183   : > { %v2332_v27 = vpop.f32.mrb[27].mxu0 }
 0x188   : > { %v3141_v28 = vpop.f32.mrb[28].mxu0 }
 0x189   : > { %v2335_v29 = vpop.f32.mrb[29].mxu0 }
 0x18a   : > { %v3143_v30 = vpop.f32.mrb[30].mxu0 }
 0x18b   : > { %v2336_v31 = vpop.f32.mrb[31].mxu0 }
 0x190   : > { %v3145_v32 = vpop.f32.mrb[32].mxu0 }
 0x191   : > { %v2339_v36 = vpop.f32.mrb[33].mxu0 }
 0x192   : > { %v3160_v40 = vpop.f32.mrb[34].mxu0 }
 0x193   : > { %v2340_v41 = vpop.f32.mrb[35].mxu0 }
 0x194   : > { %v961_v41 = vld [vmem:[%s3524_s7 + $0x58] sm:$0xff] }
 0x195   : > { %v2514_v42 = vpack.c.bf16 %v961_v41, %v960_v39  ;;  %v1623_v39 = vld [vmem:[%s3522_s5 + $0x50] sm:$0xff]  ;;  %v1624_v41 = vld [vmem:[%s3522_s5 + $0x58] sm:$0xff] }
 0x197   : > { %2515 = vmatpush3.bf16.msra.mxu1 %v2514_v42  ;;  %v1625_v42 = vld [vmem:[%s3522_s5 + $0x60] sm:$0xff] }
 0x198   : > { %v3169_v46 = vpop.f32.mrb[36].mxu0  ;;  %2516 = vmatprep.subr.bf16.mxu1 %v2794_v37 }
 0x199   : > { %v2343_v49 = vpop.f32.mrb[37].mxu0 }
 0x19a   : > { %v3178_v50 = vpop.f32.mrb[38].mxu0  ;;  %v965_v49 = vld [vmem:[%s3524_s7 + $0x78] sm:$0xff] }
 0x19b   : > { %v2344_v51 = vpop.f32.mrb[39].mxu0  ;;  %2518 = vmatpush3.bf16.msra.mxu1 %v2517_v47  ;;  %v2520_v52 = vpack.c.bf16 %v965_v49, %v964_v48 }
 0x19c   : > { %2519 = vmatprep.subr.bf16.mxu1 %v2794_v37  ;;  %v1259_v51 = vld [vmem:[%s3519_s2 + $0x68] sm:$0xff]  ;;  %v1261_v37 = vld [vmem:[%s3519_s2 + $0x78] sm:$0xff] }
 0x19f   : > { %2521 = vmatpush3.bf16.msra.mxu1 %v2520_v52 }
 0x1a0   : > { %v3187_v56 = vpop.f32.mrb[40].mxu0  ;;  %2408 = vmatprep.subr.bf16.mxu1 %v2640_v53 }
 0x1a1   : > { %v2347_v57 = vpop.f32.mrb[41].mxu0 }
 0x1a2   : > { %v3190_v58 = vpop.f32.mrb[42].mxu0  ;;  %v836_v57 = vld [vmem:[%s3520_s3 + $0x28] sm:$0xff] }
 0x1a3   : > { %v2348_v59 = vpop.f32.mrb[43].mxu0 }
 0x1a4   : > { %v838_v59 = vld [vmem:[%s3520_s3 + $0x38] sm:$0xff] }
 0x1a8   : > { %v3193_v60 = vpop.f32.mrb[44].mxu0 }
 0x1a9   : > { %v2351_v61 = vpop.f32.mrb[45].mxu0 }
 0x1aa   : > { %v3195_v62 = vpop.f32.mrb[46].mxu0  ;;  %v840_v61 = vld [vmem:[%s3520_s3 + $0x48] sm:$0xff] }
 0x1ab   : > { %v2352_v63 = vpop.f32.mrb[47].mxu0 }
 0x1ac   : > { %v842_v63 = vld [vmem:[%s3520_s3 + $0x58] sm:$0xff] }
 0x1b0   : > { %v3197_v1 = vpop.f32.mrb[48].mxu0 }
 0x1b1   : > { %v2355_v3 = vpop.f32.mrb[49].mxu0 }
 0x1b2   : > { %v3199_v5 = vpop.f32.mrb[50].mxu0  ;;  %v844_v3 = vld [vmem:[%s3520_s3 + $0x68] sm:$0xff] }
 0x1b3   : > { %v2356_v7 = vpop.f32.mrb[51].mxu0 }
 0x1b4   : > { %v846_v7 = vld [vmem:[%s3520_s3 + $0x78] sm:$0xff] }
 0x1b8   : > { %v3201_v9 = vpop.f32.mrb[52].mxu0 }
 0x1b9   : > { %v2359_v11 = vpop.f32.mrb[53].mxu0 }
 0x1ba   : > { %v3203_v13 = vpop.f32.mrb[54].mxu0  ;;  %v1613_v11 = vld [vmem:[%s3522_s5] sm:$0xff] }
 0x1bb   : > { %v2360_v15 = vpop.f32.mrb[55].mxu0  ;;  %1631 = vperm.xlu1 %2614, %v1613_v11  }
 0x1bc   : > { %v1615_v15 = vld [vmem:[%s3522_s5 + $0x10] sm:$0xff] }
 0x1bf   : > { %1641 = vperm.xlu1 %2614, %v1615_v15  }
 0x1c0   : > { %v3205_v17 = vpop.f32.mrb[56].mxu0 }
 0x1c1   : > { %v2363_v19 = vpop.f32.mrb[57].mxu0 }
 0x1c2   : > { %v3207_v21 = vpop.f32.mrb[58].mxu0  ;;  %v1614_v19 = vld [vmem:[%s3522_s5 + $0x8] sm:$0xff] }
 0x1c3   : > { %v2364_v23 = vpop.f32.mrb[59].mxu0 }
 0x1c4   : > { %v1616_v23 = vld [vmem:[%s3522_s5 + $0x18] sm:$0xff] }
 0x1c8   : > { %v3209_v25 = vpop.f32.mrb[60].mxu0 }
 0x1c9   : > { %v2367_v27 = vpop.f32.mrb[61].mxu0 }
 0x1ca   : > { %v3211_v29 = vpop.f32.mrb[62].mxu0  ;;  %v1617_v27 = vld [vmem:[%s3522_s5 + $0x20] sm:$0xff] }
 0x1cb   : > { %v2368_v31 = vpop.f32.mrb[63].mxu0  ;;  %1651 = vperm.xlu1 %2614, %v1617_v27  }
 0x1cc   : > { %v1618_v31 = vld [vmem:[%s3522_s5 + $0x28] sm:$0xff] }
 0x1d0   : > { %v3213_v33 = vpop.f32.mrb[64].mxu0 }
 0x1d1   : > { %v2371_v34 = vpop.f32.mrb[65].mxu0  ;;  %v944_v35 = vsel %vm943_vm1, %v3213_v33, -inf }
 0x1d2   : > { %945 = vmax.xlane.f32.xlu0 %v944_v35  ;;  %v828_v36 = vpop.f32.mrb[66].mxu0  ;;  %v1619_v34 = vld [vmem:[%s3522_s5 + $0x30] sm:$0xff]  ;;  %v1620_v35 = vld [vmem:[%s3522_s5 + $0x38] sm:$0xff] }
 0x1d3   : > { %v2372_v38 = vpop.f32.mrb[67].mxu0  ;;  %1661 = vperm.xlu1 %2614, %v1619_v34   ;;  %v1621_v36 = vld [vmem:[%s3522_s5 + $0x40] sm:$0xff] }
 0x1d4   : > { %v1622_v38 = vld [vmem:[%s3522_s5 + $0x48] sm:$0xff] }
 0x1d7   : > { %1671 = vperm.xlu1 %2614, %v1621_v36   ;;  %v2644_v36 = vld [vmem:[%s3523_s6 + $0x20] sm:$0xff]  }
 0x1db   : > { %1681 = vperm.xlu1 %2614, %v1623_v39  }
 0x1df   : > { %1691 = vperm.xlu1 %2614, %v1625_v42  }
 0x1e3   : > { %1701 = vperm.xlu1 %2614, %v1627_v44  }
 0x1e8   : > { %1264 = vperm.xlu0 %2613, %v1246_v45   ;;  %v1628_v45 = vld [vmem:[%s3522_s5 + $0x78] sm:$0xff] }
 0x1ec   : > { %1329 = vperm.xlu0 %2613, %v1259_v51   ;;  %v1037_v51 = vlaneseq }
 0x1ee   : > { %v3321_v52 = vshrl.u32 %v1037_v51, 7 }
 0x1f0   : > { %1339 = vperm.xlu0 %2613, %v1261_v37   ;;  %v1039_v37 = vsub.s32 0, %v3321_v52 }
 0x1f4   : > { %854 = vperm.xlu0 %2613, %v832_v54   ;;  %v2641_v54 = vld [vmem:[%s3523_s6 + $0x8] sm:$0xff]  }
 0x1f8   : > { %864 = vperm.xlu0 %2613, %v834_v55  }
 0x1fc   : > { %874 = vperm.xlu0 %2613, %v836_v57  }
 0x200   : > { %884 = vperm.xlu0 %2613, %v838_v59  }
 0x204   : > { %894 = vperm.xlu0 %2613, %v840_v61   ;;  %v2642_v61 = vld [vmem:[%s3523_s6 + $0x10] sm:$0xff]  }
 0x208   : > { %904 = vperm.xlu0 %2613, %v842_v63  }
 0x20c   : > { %914 = vperm.xlu0 %2613, %v844_v3  }
 0x210   : > { %924 = vperm.xlu0 %2613, %v846_v7  }
 0x214   : > { %1636 = vperm.xlu0 %2613, %v1614_v19  }
 0x218   : > { %1646 = vperm.xlu0 %2613, %v1616_v23  }
 0x21c   : > { %1656 = vperm.xlu0 %2613, %v1618_v31  }
 0x220   : > { %1666 = vperm.xlu0 %2613, %v1620_v35  }
 0x224   : > { %1676 = vperm.xlu0 %2613, %v1622_v38  }
 0x228   : > { %1686 = vperm.xlu0 %2613, %v1624_v41  }
 0x22c   : > { %1696 = vperm.xlu0 %2613, %v1626_v43  }
 0x230   : > { %1706 = vperm.xlu0 %2613, %v1628_v45  }
 0x25f   : > { %v946_v47 = vpop.xlane.xlu0 %945 }
 0x260   : > { %v947_v48 = vsub.f32 %v3213_v33, %v946_v47 }
 0x262   : > { %v948_v49 = vmul.f32 1.442695, %v947_v48 }
 0x264   : > { %2656 = vpow2.f32 %v948_v49 }
 0x26e   : > { %v2657_v55 = vpop.eup %2656 }
 0x26f   : > { %v1040_v57 = vrot.slane %v2657_v55, %v1039_v37  ;;  %2406 = vmatmul.mubr.f32.vlgmr.msra.gmra.mrb[0].mxu1 %v2657_v55 }
 0x270   : > { %2409 = vmatpush3.bf16.msra.mxu1 %v2640_v53 }
 0x271   : > { %2410 = vmatprep.subr.bf16.mxu1 %v2641_v54  ;;  %v1041_v33 = vmul.f32 %v1040_v57, %v3113_v0  ;;  %v1042_v59 = vmul.f32 %v1040_v57, %v3115_v2  ;;  %v1043_v63 = vmul.f32 %v1040_v57, %v3117_v4  ;;  %v1044_v3 = vmul.f32 %v1040_v57, %v3119_v6  ;;  %v2643_v6 = vld [vmem:[%s3523_s6 + $0x18] sm:$0xff]  }
 0x272   : > { %v1045_v7 = vmul.f32 %v1040_v57, %v3121_v8  ;;  %v1046_v11 = vmul.f32 %v1040_v57, %v3123_v10  ;;  %v1047_v15 = vmul.f32 %v1040_v57, %v3125_v12  ;;  %v1048_v53 = vmul.f32 %v1040_v57, %v3127_v14 }
 0x273   : > { %v1057_v19 = vpack.c.bf16 %v1042_v59, %v1041_v33  ;;  %v1058_v0 = vpack.c.bf16 %v1044_v3, %v1043_v63  ;;  %v1049_v2 = vmul.f32 %v1040_v57, %v3129_v16  ;;  %v1050_v23 = vmul.f32 %v1040_v57, %v3131_v18 }
 0x274   : > { %2411 = vmatpush3.bf16.msra.mxu1 %v2641_v54  ;;  %v1059_v27 = vpack.c.bf16 %v1046_v11, %v1045_v7  ;;  %v1060_v31 = vpack.c.bf16 %v1048_v53, %v1047_v15  ;;  %v1051_v4 = vmul.f32 %v1040_v57, %v3133_v20  ;;  %v1052_v10 = vmul.f32 %v1040_v57, %v3135_v22  ;;  %v2645_v22 = vld [vmem:[%s3523_s6 + $0x28] sm:$0xff]  }
 0x275   : > { %2424 = vmatprep.mubr.bf16.mxu1 %v1057_v19  ;;  %2412 = vmatprep.subr.bf16.mxu1 %v2642_v61  ;;  %v1061_v8 = vpack.c.bf16 %v1050_v23, %v1049_v2  ;;  %v1053_v12 = vmul.f32 %v1040_v57, %v3137_v24  ;;  %v1054_v14 = vmul.f32 %v1040_v57, %v3139_v26  ;;  %v2646_v24 = vld [vmem:[%s3523_s6 + $0x30] sm:$0xff]   ;;  %v2647_v26 = vld [vmem:[%s3523_s6 + $0x38] sm:$0xff]  }
 0x276   : > { %v1055_v16 = vmul.f32 %v1040_v57, %v3141_v28  ;;  %v1056_v18 = vmul.f32 %v1040_v57, %v3143_v30  ;;  %v1062_v34 = vpack.c.bf16 %v1052_v10, %v1051_v4  ;;  %v1358_v28 = vld [vmem:[%s3525_s8] sm:$0x3]  ;;  %v1270_v30 = vpop.permute.xlu1 %1269 }
 0x277   : > { %v1063_v20 = vpack.c.bf16 %v1054_v14, %v1053_v12 }
 0x278   : > { %2413 = vmatpush3.bf16.msra.mxu1 %v2642_v61  ;;  %v1064_v35 = vpack.c.bf16 %v1056_v18, %v1055_v16  ;;  %v1265_v61 = vpop.permute.xlu0 %1264 }
 0x279   : > { %2414 = vmatprep.subr.bf16.mxu1 %v2643_v6 }
 0x27a   : > { %v1275_v38 = vpop.permute.xlu1 %1274 }
 0x27c   : > { %2415 = vmatpush3.bf16.msra.mxu1 %v2643_v6 }
 0x27d   : > { %2416 = vmatprep.subr.bf16.mxu1 %v2644_v36 }
 0x27e   : > { %v1280_v42 = vpop.permute.xlu1 %1279 }
 0x280   : > { %2417 = vmatpush3.bf16.msra.mxu1 %v2644_v36 }
 0x281   : > { %2418 = vmatprep.subr.bf16.mxu1 %v2645_v22 }
 0x282   : > { %v1285_v43 = vpop.permute.xlu1 %1284 }
 0x284   : > { %2419 = vmatpush3.bf16.msra.mxu1 %v2645_v22 }
 0x285   : > { %2420 = vmatprep.subr.bf16.mxu1 %v2646_v24 }
 0x286   : > { %v1290_v44 = vpop.permute.xlu1 %1289 }
 0x288   : > { %2421 = vmatpush3.bf16.msra.mxu1 %v2646_v24 }
 0x289   : > { %2422 = vmatprep.subr.bf16.mxu1 %v2647_v26 }
 0x28a   : > { %v1295_v45 = vpop.permute.xlu1 %1294 }
 0x28c   : > { %2423 = vmatpush3.bf16.msra.mxu1 %v2647_v26 }
 0x28d   : > { %2440 = vmatprep.subr.msk.mxu1 %vm1408_vm2, %v1358_v28 }
 0x28e   : > { %v1300_v47 = vpop.permute.xlu1 %1299 }
 0x28f   : > { %2425 = vmatmul.mubr.bf16.vlgmr.msra.gmra.mrb[4].mxu1 %v1058_v0 }
 0x290   : > { %2428 = vmatprep.mubr.bf16.mxu1 %v1059_v27  ;;  %2441 = vmatpush3.msk.msra.mxu1 %vm1408_vm2, %v1358_v28 }
 0x292   : > { %v1305_v51 = vpop.permute.xlu1 %1304 }
 0x296   : > { %v1310_v15 = vpop.permute.xlu1 %1309 }
 0x297   : > { %2429 = vmatmul.mubr.bf16.gmra.mrb[8].mxu1 %v1060_v31 }
 0x298   : > { %2432 = vmatprep.mubr.bf16.mxu1 %v1061_v8 }
 0x29a   : > { %v1315_v6 = vpop.permute.xlu1 %1314 }
 0x29f   : > { %2433 = vmatmul.mubr.bf16.gmra.mrb[12].mxu1 %v1062_v34 }
 0x2a0   : > { %2436 = vmatprep.mubr.bf16.mxu1 %v1063_v20  ;;  %v1320_v20 = vpop.permute.xlu1 %1319 }
 0x2a7   : > { %2437 = vmatmul.mubr.bf16.gmra.mrb[16].mxu1 %v1064_v35 }
 0x342   : > { %v1032_v39 = vpop.f32.mrb[0].mxu1 }
 0x343   : > { %v2407_v41 = vpop.f32.mrb[1].mxu1  ;;  %2658 = vrcp.f32 %v1032_v39 }
 0x344   : > { %v1325_v41 = vpop.permute.xlu1 %1324 }
 0x34d   : > { %v2659_v48 = vpop.eup %2658 }
 0x34e   : > { %v3368_v49 = vrot.slane %v2659_v48, %v1039_v37 }
 0x362   : > { %v2426_v54 = vpop.f32.mrb[4].mxu1 }
 0x363   : > { %v1232_v55 = vmul.f32 %v2426_v54, %v3368_v49  ;;  %v1163_v57 = vpop.f32.mrb[5].mxu1 }
 0x364   : > { %v1230_v33 = vmul.f32 %v3368_v49, %v1163_v57  ;;  %v2427_v59 = vpop.f32.mrb[6].mxu1 }
 0x365   : > { %v1233_v63 = vmul.f32 %v2427_v59, %v3368_v49  ;;  %v1166_v3 = vpop.f32.mrb[7].mxu1  ;;  %v1344_v37 = vadd.f32 %v1275_v38, %v1232_v55  ;;  %v1335_v59 = vpop.permute.xlu1 %1334 }
 0x366   : > { %v1342_v7 = vadd.f32 %v1265_v61, %v1230_v33  ;;  %v1231_v11 = vmul.f32 %v3368_v49, %v1166_v3 }
 0x367   : > { %v1345_v2 = vadd.f32 %v1280_v42, %v1233_v63 }
 0x368   : > { %v1343_v52 = vadd.f32 %v1270_v30, %v1231_v11  ;;  %2442 = vmatprep.mubr.msk.f32.mxu1 %vm1359_vm3, %v1342_v7  ;;  %v2648_v11 = vld [vmem:[%s3521_s4] sm:$0xff]  }
 0x36a   : > { %v2430_v53 = vpop.f32.mrb[8].mxu1  ;;  %2443 = vmatmul.mubr.msk.f32.vlgmr.msra.gmra.mrb[2].mxu1 %vm1359_vm3, %v1343_v52 }
 0x36b   : > { %v1236_v19 = vmul.f32 %v2430_v53, %v3368_v49  ;;  %v1179_v0 = vpop.f32.mrb[9].mxu1  ;;  %2445 = vmatprep.mubr.msk.f32.mxu1 %vm1359_vm3, %v1344_v37  ;;  %v850_v37 = vpop.permute.xlu1 %849 }
 0x36c   : > { %v1234_v23 = vmul.f32 %v3368_v49, %v1179_v0  ;;  %v2431_v27 = vpop.f32.mrb[10].mxu1 }
 0x36d   : > { %v1237_v31 = vmul.f32 %v2431_v27, %v3368_v49  ;;  %v1182_v4 = vpop.f32.mrb[11].mxu1  ;;  %v1348_v14 = vadd.f32 %v1295_v45, %v1236_v19  ;;  %v927_v19 = vadd.f32 %v850_v37, %v3145_v32 }
 0x36e   : > { %v1346_v8 = vadd.f32 %v1285_v43, %v1234_v23  ;;  %v1235_v10 = vmul.f32 %v3368_v49, %v1182_v4  ;;  %2446 = vmatmul.mubr.msk.f32.gmra.mrb[20].mxu1 %vm1359_vm3, %v1345_v2 }
 0x36f   : > { %v1349_v35 = vadd.f32 %v1300_v47, %v1237_v31  ;;  %v860_v2 = vpop.permute.xlu1 %859  ;;  %v1557_v31 = vmax.f32 %v927_v19, 0.0 }
 0x370   : > { %v1347_v12 = vadd.f32 %v1290_v44, %v1235_v10  ;;  %2448 = vmatprep.mubr.msk.f32.mxu1 %vm1359_vm3, %v1346_v8  ;;  %v929_v4 = vadd.f32 %v860_v2, %v3169_v46 }
 0x372   : > { %v2434_v16 = vpop.f32.mrb[12].mxu1  ;;  %2449 = vmatmul.mubr.msk.f32.gmra.mrb[22].mxu1 %vm1359_vm3, %v1347_v12 }
 0x373   : > { %v1240_v18 = vmul.f32 %v2434_v16, %v3368_v49  ;;  %v1195_v34 = vpop.f32.mrb[13].mxu1  ;;  %2451 = vmatprep.mubr.msk.f32.mxu1 %vm1359_vm3, %v1348_v14  ;;  %v870_v8 = vpop.permute.xlu1 %869 }
 0x374   : > { %v1238_v36 = vmul.f32 %v3368_v49, %v1195_v34  ;;  %v2435_v22 = vpop.f32.mrb[14].mxu1  ;;  %v931_v32 = vadd.f32 %v870_v8, %v3187_v56 }
 0x375   : > { %v1241_v24 = vmul.f32 %v2435_v22, %v3368_v49  ;;  %v1198_v26 = vpop.f32.mrb[15].mxu1  ;;  %v1352_v39 = vadd.f32 %v1315_v6, %v1240_v18 }
 0x376   : > { %v1350_v28 = vadd.f32 %v1305_v51, %v1238_v36  ;;  %v1239_v30 = vmul.f32 %v3368_v49, %v1198_v26  ;;  %2452 = vmatmul.mubr.msk.f32.gmra.mrb[24].mxu1 %vm1359_vm3, %v1349_v35  ;;  %v1330_v51 = vpop.permute.xlu0 %1329 }
 0x377   : > { %v1353_v45 = vadd.f32 %v1320_v20, %v1241_v24  ;;  %v880_v36 = vpop.permute.xlu1 %879 }
 0x378   : > { %v1351_v38 = vadd.f32 %v1310_v15, %v1239_v30  ;;  %2454 = vmatprep.mubr.msk.f32.mxu1 %vm1359_vm3, %v1350_v28  ;;  %v1561_v28 = vmax.f32 %v931_v32, 0.0  ;;  %v933_v30 = vadd.f32 %v880_v36, %v3193_v60 }
 0x37a   : > { %v2438_v42 = vpop.f32.mrb[16].mxu1  ;;  %2455 = vmatmul.mubr.msk.f32.gmra.mrb[26].mxu1 %vm1359_vm3, %v1351_v38  ;;  %v1340_v3 = vpop.permute.xlu0 %1339 }
 0x37b   : > { %v1244_v43 = vmul.f32 %v2438_v42, %v3368_v49  ;;  %v1211_v44 = vpop.f32.mrb[17].mxu1  ;;  %2457 = vmatprep.mubr.msk.f32.mxu1 %vm1359_vm3, %v1352_v39 }
 0x37c   : > { %v1242_v47 = vmul.f32 %v3368_v49, %v1211_v44  ;;  %v2439_v48 = vpop.f32.mrb[18].mxu1 }
 0x37d   : > { %v1245_v54 = vmul.f32 %v2439_v48, %v3368_v49  ;;  %v1214_v55 = vpop.f32.mrb[19].mxu1  ;;  %v1356_v63 = vadd.f32 %v1335_v59, %v1244_v43 }
 0x37e   : > { %v1354_v57 = vadd.f32 %v1325_v41, %v1242_v47  ;;  %v1243_v33 = vmul.f32 %v3368_v49, %v1214_v55  ;;  %2458 = vmatmul.mubr.msk.f32.gmra.mrb[28].mxu1 %vm1359_vm3, %v1353_v45  ;;  %v855_v49 = vpop.permute.xlu0 %854  ;;  %v890_v41 = vpop.permute.xlu1 %889  ;;  %v1563_v47 = vmax.f32 %v933_v30, 0.0 }
 0x37f   : > { %v1357_v7 = vadd.f32 %v1340_v3, %v1245_v54  ;;  %v928_v53 = vadd.f32 %v855_v49, %v3160_v40  ;;  %v1559_v40 = vmax.f32 %v929_v4, 0.0  ;;  %v935_v48 = vadd.f32 %v890_v41, %v3197_v1 }
 0x380   : > { %v1355_v61 = vadd.f32 %v1330_v51, %v1243_v33  ;;  %2460 = vmatprep.mubr.msk.f32.mxu1 %vm1359_vm3, %v1354_v57 }
 0x381   : > { %v1558_v23 = vmax.f32 %v928_v53, 0.0 }
 0x382   : > { %2461 = vmatmul.mubr.msk.f32.gmra.mrb[30].mxu1 %vm1359_vm3, %v1355_v61  ;;  %v865_v15 = vpop.permute.xlu0 %864  ;;  %v900_v54 = vpop.permute.xlu1 %899 }
 0x383   : > { %2463 = vmatprep.mubr.msk.f32.mxu1 %vm1359_vm3, %v1356_v63  ;;  %v930_v27 = vadd.f32 %v865_v15, %v3178_v50  ;;  %v1565_v63 = vmax.f32 %v935_v48, 0.0  ;;  %v937_v3 = vadd.f32 %v900_v54, %v3201_v9 }
 0x385   : > { %v1560_v18 = vmax.f32 %v930_v27, 0.0  ;;  %v1567_v53 = vmax.f32 %v937_v3, 0.0 }
 0x386   : > { %2464 = vmatmul.mubr.msk.f32.gmra.mrb[32].mxu1 %vm1359_vm3, %v1357_v7  ;;  %v875_v52 = vpop.permute.xlu0 %874 }
 0x387   : > { %2482 = vmatprep.mubr.bf16.mxu1 %v2648_v11  ;;  %v932_v34 = vadd.f32 %v875_v52, %v3190_v58  ;;  %v910_v11 = vpop.permute.xlu1 %909 }
 0x388   : > { %v939_v19 = vadd.f32 %v910_v11, %v3205_v17 }
 0x389   : > { %v1562_v46 = vmax.f32 %v932_v34, 0.0 }
 0x38a   : > { %v885_v0 = vpop.permute.xlu0 %884  ;;  %v1569_v8 = vmax.f32 %v939_v19, 0.0 }
 0x38b   : > { %v934_v26 = vadd.f32 %v885_v0, %v3195_v62 }
 0x38d   : > { %v1564_v44 = vmax.f32 %v934_v26, 0.0  ;;  %v2654_v26 = vld [vmem:[%s3521_s4 + $0x30] sm:$0xff]  }
 0x38e   : > { %v895_v14 = vpop.permute.xlu0 %894 }
 0x38f   : > { %v936_v45 = vadd.f32 %v895_v14, %v3199_v5 }
 0x391   : > { %v1566_v59 = vmax.f32 %v936_v45, 0.0 }
 0x392   : > { %v905_v38 = vpop.permute.xlu0 %904 }
 0x393   : > { %v938_v61 = vadd.f32 %v905_v38, %v3203_v13 }
 0x395   : > { %v1568_v52 = vmax.f32 %v938_v61, 0.0 }
 0x396   : > { %v915_v57 = vpop.permute.xlu0 %914 }
 0x397   : > { %v940_v37 = vadd.f32 %v915_v57, %v3207_v21 }
 0x399   : > { %v1570_v4 = vmax.f32 %v940_v37, 0.0 }
 0x39a   : > { %v925_v0 = vpop.permute.xlu0 %924 }
 0x39e   : > { %v1637_v38 = vpop.permute.xlu0 %1636 }
 0x43d   : > { %v2444_v6 = vpop.f32.mrb[2].mxu1 }
 0x43e   : > { %v1574_v10 = vmul.f32 %v2444_v6, %v1558_v23  ;;  %v1478_v12 = vpop.f32.mrb[3].mxu1  ;;  %v920_v23 = vpop.permute.xlu1 %919  ;;  %v942_v6 = vadd.f32 %v925_v0, %v3211_v29 }
 0x43f   : > { %v1573_v16 = vmul.f32 %v1557_v31, %v1478_v12 }
 0x441   : > { %v1605_v20 = vpack.c.bf16 %v1574_v10, %v1573_v16  ;;  %v2447_v35 = vpop.f32.mrb[20].mxu1  ;;  %v941_v10 = vadd.f32 %v920_v23, %v3209_v25  ;;  %v2649_v25 = vld [vmem:[%s3521_s4 + $0x8] sm:$0xff]  }
 0x442   : > { %v1576_v22 = vmul.f32 %v2447_v35, %v1560_v18  ;;  %v1488_v50 = vpop.f32.mrb[21].mxu1  ;;  %v1572_v18 = vmax.f32 %v942_v6, 0.0  ;;  %v1632_v30 = vpop.permute.xlu1 %1631 }
 0x443   : > { %v1575_v24 = vmul.f32 %v1559_v40, %v1488_v50  ;;  %2466 = vmatprep.subr.bf16.mxu1 %v1605_v20  ;;  %v1571_v34 = vmax.f32 %v941_v10, 0.0  ;;  %v2651_v50 = vld [vmem:[%s3521_s4 + $0x18] sm:$0xff]  }
 0x444   : > { %2467 = vmatpush3.bf16.msra.mxu1 %v1605_v20 }
 0x445   : > { %v1606_v39 = vpack.c.bf16 %v1576_v22, %v1575_v24  ;;  %v2450_v58 = vpop.f32.mrb[22].mxu1  ;;  %v2650_v22 = vld [vmem:[%s3521_s4 + $0x10] sm:$0xff]   ;;  %v2652_v24 = vld [vmem:[%s3521_s4 + $0x20] sm:$0xff]  }
 0x446   : > { %v1578_v42 = vmul.f32 %v2450_v58, %v1562_v46  ;;  %v1498_v56 = vpop.f32.mrb[23].mxu1  ;;  %v2653_v46 = vld [vmem:[%s3521_s4 + $0x28] sm:$0xff]   ;;  %v1647_v58 = vpop.permute.xlu0 %1646 }
 0x447   : > { %v1577_v43 = vmul.f32 %v1561_v28, %v1498_v56  ;;  %2468 = vmatprep.subr.bf16.mxu1 %v1606_v39  ;;  %v2655_v28 = vld [vmem:[%s3521_s4 + $0x38] sm:$0xff]  }
 0x448   : > { %2469 = vmatpush3.bf16.msra.mxu1 %v1606_v39  ;;  %v1642_v39 = vpop.permute.xlu1 %1641 }
 0x449   : > { %v1607_v62 = vpack.c.bf16 %v1578_v42, %v1577_v43  ;;  %v2453_v51 = vpop.f32.mrb[24].mxu1 }
 0x44a   : > { %v1580_v55 = vmul.f32 %v2453_v51, %v1564_v44  ;;  %v1508_v60 = vpop.f32.mrb[25].mxu1  ;;  %v1657_v42 = vpop.permute.xlu0 %1656 }
 0x44b   : > { %v1579_v33 = vmul.f32 %v1563_v47, %v1508_v60  ;;  %2470 = vmatprep.subr.bf16.mxu1 %v1607_v62 }
 0x44c   : > { %2471 = vmatpush3.bf16.msra.mxu1 %v1607_v62  ;;  %v1652_v41 = vpop.permute.xlu1 %1651 }
 0x44d   : > { %v1608_v5 = vpack.c.bf16 %v1580_v55, %v1579_v33  ;;  %v2456_v7 = vpop.f32.mrb[26].mxu1 }
 0x44e   : > { %v1582_v49 = vmul.f32 %v2456_v7, %v1566_v59  ;;  %v1518_v1 = vpop.f32.mrb[27].mxu1  ;;  %v1667_v45 = vpop.permute.xlu0 %1666 }
 0x44f   : > { %v1581_v15 = vmul.f32 %v1565_v63, %v1518_v1  ;;  %2472 = vmatprep.subr.bf16.mxu1 %v1608_v5 }
 0x450   : > { %2473 = vmatpush3.bf16.msra.mxu1 %v1608_v5  ;;  %v1662_v43 = vpop.permute.xlu1 %1661 }
 0x451   : > { %v1609_v13 = vpack.c.bf16 %v1582_v49, %v1581_v15  ;;  %v2459_v2 = vpop.f32.mrb[28].mxu1 }
 0x452   : > { %v1584_v27 = vmul.f32 %v2459_v2, %v1568_v52  ;;  %v1528_v9 = vpop.f32.mrb[29].mxu1  ;;  %v1677_v59 = vpop.permute.xlu0 %1676 }
 0x453   : > { %v1583_v31 = vmul.f32 %v1567_v53, %v1528_v9  ;;  %2474 = vmatprep.subr.bf16.mxu1 %v1609_v13 }
 0x454   : > { %2475 = vmatpush3.bf16.msra.mxu1 %v1609_v13  ;;  %v1672_v33 = vpop.permute.xlu1 %1671 }
 0x455   : > { %v1610_v21 = vpack.c.bf16 %v1584_v27, %v1583_v31  ;;  %v2462_v12 = vpop.f32.mrb[30].mxu1 }
 0x456   : > { %v1586_v14 = vmul.f32 %v2462_v12, %v1570_v4  ;;  %v1538_v16 = vpop.f32.mrb[31].mxu1  ;;  %v1687_v37 = vpop.permute.xlu0 %1686 }
 0x457   : > { %v1585_v17 = vmul.f32 %v1569_v8, %v1538_v16  ;;  %2476 = vmatprep.subr.bf16.mxu1 %v1610_v21 }
 0x458   : > { %2477 = vmatpush3.bf16.msra.mxu1 %v1610_v21  ;;  %v1682_v15 = vpop.permute.xlu1 %1681 }
 0x459   : > { %v1611_v40 = vpack.c.bf16 %v1586_v14, %v1585_v17  ;;  %v2465_v32 = vpop.f32.mrb[32].mxu1 }
 0x45a   : > { %v1588_v20 = vmul.f32 %v2465_v32, %v1572_v18  ;;  %v1548_v35 = vpop.f32.mrb[33].mxu1  ;;  %v1697_v31 = vpop.permute.xlu0 %1696 }
 0x45b   : > { %v1587_v36 = vmul.f32 %v1571_v34, %v1548_v35  ;;  %2478 = vmatprep.subr.bf16.mxu1 %v1611_v40 }
 0x45c   : > { %2479 = vmatpush3.bf16.msra.mxu1 %v1611_v40  ;;  %v1692_v2 = vpop.permute.xlu1 %1691 }
 0x45d   : > { %v1612_v29 = vpack.c.bf16 %v1588_v20, %v1587_v36 }
 0x45e   : > { %v1707_v16 = vpop.permute.xlu0 %1706 }
 0x45f   : > { %2480 = vmatprep.subr.bf16.mxu1 %v1612_v29 }
 0x460   : > { %2481 = vmatpush3.bf16.msra.mxu1 %v1612_v29  ;;  %v1702_v12 = vpop.permute.xlu1 %1701 }
 0x463   : > { %2483 = vmatmul.mubr.bf16.vlgmr.msra.gmra.mrb[36].mxu1 %v2649_v25 }
 0x464   : > { %2486 = vmatprep.mubr.bf16.mxu1 %v2650_v22 }
 0x46b   : > { %2487 = vmatmul.mubr.bf16.gmra.mrb[40].mxu1 %v2651_v50 }
 0x46c   : > { %2490 = vmatprep.mubr.bf16.mxu1 %v2652_v24 }
 0x473   : > { %2491 = vmatmul.mubr.bf16.gmra.mrb[44].mxu1 %v2653_v46 }
 0x474   : > { %2494 = vmatprep.mubr.bf16.mxu1 %v2654_v26 }
 0x47b   : > { %2495 = vmatmul.mubr.bf16.gmra.mrb[48].mxu1 %v2655_v28 }
 0x536   : > { %v2484_v56 = vpop.f32.mrb[36].mxu1 }
 0x537   : > { %v1791_v44 = vpop.f32.mrb[37].mxu1  ;;  %v1800_v48 = vadd.f32 %v2484_v56, %v1642_v39 }
 0x538   : > { %v2485_v47 = vpop.f32.mrb[38].mxu1  ;;  %v1792_v54 = vadd.f32 %v1791_v44, %v1632_v30 }
 0x539   : > { %v1803_v62 = vadd.f32 %v2485_v47, %v1647_v58  ;;  %v1794_v51 = vpop.f32.mrb[39].mxu1 }
 0x53a   : > { %v1795_v55 = vadd.f32 %v1794_v51, %v1637_v38 }
 0x53b   : > { %v2159_v60 = vpack.c.bf16 %v1803_v62, %v1800_v48 }
 0x53c   : > { %v2154_v57 = vpack.c.bf16 %v1795_v55, %v1792_v54 }
 0x53d   : > { %2191 = vst [vmem:[%s3443_s17 + $0x8] sm:$0xff] %v2159_v60  }
 0x53e   : > { %2155 = vst [vmem:[%s3443_s17] sm:$0xff] %v2154_v57   ;;  %v2488_v61 = vpop.f32.mrb[40].mxu1 }
 0x53f   : > { %v1807_v63 = vpop.f32.mrb[41].mxu1  ;;  %v1816_v5 = vadd.f32 %v2488_v61, %v1662_v43 }
 0x540   : > { %v2489_v3 = vpop.f32.mrb[42].mxu1  ;;  %v1808_v49 = vadd.f32 %v1807_v63, %v1652_v41 }
 0x541   : > { %v1819_v7 = vadd.f32 %v2489_v3, %v1667_v45  ;;  %v1810_v11 = vpop.f32.mrb[43].mxu1 }
 0x542   : > { %v1811_v1 = vadd.f32 %v1810_v11, %v1657_v42 }
 0x543   : > { %v2169_v52 = vpack.c.bf16 %v1819_v7, %v1816_v5 }
 0x544   : > { %v2164_v53 = vpack.c.bf16 %v1811_v1, %v1808_v49 }
 0x545   : > { %2193 = vst [vmem:[%s3443_s17 + $0x18] sm:$0xff] %v2169_v52  }
 0x546   : > { %2192 = vst [vmem:[%s3443_s17 + $0x10] sm:$0xff] %v2164_v53   ;;  %v2492_v19 = vpop.f32.mrb[44].mxu1 }
 0x547   : > { %v1823_v0 = vpop.f32.mrb[45].mxu1  ;;  %v1832_v23 = vadd.f32 %v2492_v19, %v1682_v15 }
 0x548   : > { %v2493_v13 = vpop.f32.mrb[46].mxu1  ;;  %v1824_v4 = vadd.f32 %v1823_v0, %v1672_v33 }
 0x549   : > { %v1835_v27 = vadd.f32 %v2493_v13, %v1687_v37  ;;  %v1826_v9 = vpop.f32.mrb[47].mxu1 }
 0x54a   : > { %v1827_v6 = vadd.f32 %v1826_v9, %v1677_v59 }
 0x54b   : > { %v2179_v8 = vpack.c.bf16 %v1835_v27, %v1832_v23 }
 0x54c   : > { %v2174_v10 = vpack.c.bf16 %v1827_v6, %v1824_v4 }
 0x54d   : > { %2195 = vst [vmem:[%s3443_s17 + $0x28] sm:$0xff] %v2179_v8  }
 0x54e   : > { %2194 = vst [vmem:[%s3443_s17 + $0x20] sm:$0xff] %v2174_v10   ;;  %v2496_v21 = vpop.f32.mrb[48].mxu1 }
 0x54f   : > { %v1839_v14 = vpop.f32.mrb[49].mxu1  ;;  %v1848_v18 = vadd.f32 %v2496_v21, %v1702_v12 }
 0x550   : > { %v2497_v17 = vpop.f32.mrb[50].mxu1  ;;  %v1840_v32 = vadd.f32 %v1839_v14, %v1692_v2 }
 0x551   : > { %v1851_v34 = vadd.f32 %v2497_v17, %v1707_v16  ;;  %v1842_v40 = vpop.f32.mrb[51].mxu1 }
 0x552   : > { %v1843_v20 = vadd.f32 %v1842_v40, %v1697_v31 }
 0x553   : > { %v2189_v35 = vpack.c.bf16 %v1851_v34, %v1848_v18 }
 0x554   : > { %v2184_v36 = vpack.c.bf16 %v1843_v20, %v1840_v32 }
 0x555   : > { %2197 = vst [vmem:[%s3443_s17 + $0x38] sm:$0xff] %v2189_v35  }
 0x556   : > { %2196 = vst [vmem:[%s3443_s17 + $0x30] sm:$0xff] %v2184_v36  }
 0x557   : > { %2701 = shalt.err (!%p2698_p11)
}
 0x558   : > { %s2702_s9 = scalar_lea.hbm %s3459_s29, 1024  ;;  %s2706_s19 = scalar_lea.hbm %s3557_s28, 8192 }
 0x559   : > { %p2703_p12 = scmp.ne.s32.totalorder %s3459_s29, %s2702_s9  ;;  %p2707_p6 = scmp.lt.u32.totalorder %s3459_s29, %s3557_s28 }
 0x55a   : > { %p2708_p3 = scmp.lt.u32.totalorder %s2706_s19, %s2702_s9  ;;  %p2710_p9 = scmp.lt.u32.totalorder %s2702_s9, %s3459_s29 }
 0x55b   : > { %p2704_p1 = pnand %p2703_p12, %p3558_p13 }
 0x55c   : > { %p2709_p8 = por %p2708_p3, %p2707_p6 }
 0x55d   : > { %p2705_p4 = pneg %p2704_p1 }
 0x55e   : > { %p2711_p0 = por %p2710_p9, %p2709_p8 }
 0x560   : > { %p2712_p2 = pnand %p2711_p0, %p2705_p4 }
 0x562   : > { %2715 = shalt.err (!%p2712_p2)
}
 0x563   : > { %s2796_s13 = smov 64   ;;  %s2797_s12 = smov 128  }
 0x564   : > { %s2798_s25 = smov 4  }
 0x565   : > { %2526 = dma.vmem_to_hbm [thread:$0]  (%p3558_p13), %s3454_s22, 1024, %s3459_s29, %s3465_s30, %s2796_s13, %s2797_s12, %s2798_s25  }
 0x566 PF: > { %s3559_s26 = sld [smem:[#allocation9_spill]]  ;;  %s3560_s27 = sld [smem:[#allocation14_spill]] }
 0x567   : > { %p2538_p5 = scmp.ge.s32.totalorder %s2786_s16, 2 }
 0x56c   : > { %s1964_s18 = sand.u32 1, %s3559_s26   ;;  %p3561_p7 = scmp.ne.s32.totalorder %s3560_s27, 0 }
 0x56d   : > { %s1965_s9 = scalar_lea.sflag [#allocation5], %s1964_s18 }
 0x56e   : > { %p2533_p10 = pnand %p2538_p5, %p3561_p7 }
 0x570   : > { %2753 = dma.done.wait (!%p2533_p10), %s1965_s9, 1024  }
 0x571   : > { %2755 = vsyncadd (!%p2533_p10), %s1965_s9, 4294966272  ;;  %s23_s16 = sadd.s32 1, %s2786_s16   ;;  %s3562_s17 = sld [smem:[#allocation15_spill]] }
 0x572   : > { %p20_p11 = scmp.ge.s32.totalorder %s23_s16, 10   ;;  %s3563_s22 = sld [smem:[#allocation11_spill]] }
 0x573   : > { %s3564_s20 = sld [smem:[#allocation12_spill]]  ;;  %s3565_s30 = smov %s2762_s10 }
 0x574   : > { %s3566_s10 = smov %s2766_s11  ;;  %s3568_s12 = smov %s2778_s14 }
 0x575   : > { %s3569_s13 = smov %s2782_s15  ;;  %22 = sbr.rel (!%p20_p11) target bundleno = 8 (0x8), region = 142 }
 0x577   : > { %s3567_s11 = smov %s3562_s17 }
 0x578   : > { %s3570_s14 = smov %s3563_s22 }
 0x579   : > { %s3571_s15 = smov %s3564_s20 }
 0x57c   :  { %1970 = vsyncpa [#allocation4], 1 }
 0x57d   :  { %1972 = vsyncpa [#allocation4 + $0x1], 1 }
 0x57e   :  { %1973 = vsyncpa [#allocation5], 1 }
 0x57f   :  { %1975 = vsyncpa [#allocation5 + $0x1], 1 }

</bundles_post_ra>
